<compile_context>
chip_gen: v5e
topology: v5e:2x2
jax: 0.10.0
libtpu: 0.0.40
codegen_flags: <defaults>
</compile_context>

<pallas_src>
import functools

import jax
import jax.numpy as jnp
from jax.experimental import pallas as pl
from jax.experimental.pallas import tpu as pltpu

CTX_DIM = 512
N_CTX = 4                                    # prefix context tokens after SOS
N_CLS_CTX = 4                                # learned class-conditional tokens
SEQ_LEN = 77                                 # CLIP tokenizer context length
N_PREFIX = N_CTX + 1                         # 5
N_SUFFIX = SEQ_LEN - (N_PREFIX + N_CLS_CTX)  # 68
IMG_DIM = 768
HIDDEN = IMG_DIM // 16                       # 48 (as in the PyTorch module)
HIDDEN_PAD = 128                             # zero-padded -> lane/MXU aligned (exact math)

PRE_W = N_PREFIX * CTX_DIM                   # 2560  (multiple of 128)
CTX_W = N_CLS_CTX * CTX_DIM                  # 2048  (multiple of 128)
SUF_W = N_SUFFIX * CTX_DIM                   # 34816 (multiple of 128)
TOTAL_W = SEQ_LEN * CTX_DIM                  # 39424

MAX_TILE_B = 64                              # f32 out block double-buffered ~20 MiB; safe everywhere


def _prompt_kernel(img_ref, w1_ref, b1_ref, w2_ref, b2_ref, pre_ref, suf_ref, out_ref):
    """One batch tile: run meta_net and write the full flattened prompt block once."""
    tb = img_ref.shape[0]

    # ---- meta_net: Linear(768->128pad) + ReLU + Linear(128pad->2048) ----
    # bf16 MXU inputs, f32 accumulation; bias add + ReLU stay in f32 (v5e-safe).
    h = jnp.dot(img_ref[...], w1_ref[...], preferred_element_type=jnp.float32)
    h = jnp.maximum(h + b1_ref[...], 0.0)                                   # (tb, 128) f32
    ctx = jnp.dot(h.astype(w2_ref.dtype), w2_ref[...],
                  preferred_element_type=jnp.float32) + b2_ref[...]         # (tb, 2048) f32

    # ---- write the whole output block exactly once (all slices 128-lane aligned) ----
    out_ref[:, :PRE_W] = jnp.broadcast_to(pre_ref[...], (tb, PRE_W)).astype(out_ref.dtype)
    out_ref[:, PRE_W:PRE_W + CTX_W] = ctx.astype(out_ref.dtype)
    out_ref[:, PRE_W + CTX_W:] = jnp.broadcast_to(suf_ref[...], (tb, SUF_W)).astype(out_ref.dtype)


def _pick_tile_b(B):
    """Largest multiple-of-8 divisor of B (<= MAX_TILE_B), preferring >= 2 grid steps (v7x)."""
    single_step = None
    for t in range(MAX_TILE_B, 0, -8):
        if B % t == 0:
            if B // t >= 2:
                return t
            if single_step is None:
                single_step = t
    if single_step is not None:
        return single_step
    # TODO(synk): pad the batch to a multiple of 8 instead of a single full-batch block.
    return B


@functools.partial(jax.jit, static_argnames=("tile_b", "out_dtype"))
def conditional_prompt_learner(img, w1, b1, w2, b2, prefix, suffix, *,
                               tile_b=None, out_dtype=jnp.float32):
    """img (B,768); w1 (768,48); b1 (48,); w2 (48,2048); b2 (2048,);
    prefix (5,512); suffix (68,512)  ->  prompts (B,77,512) in out_dtype."""
    B = img.shape[0]
    if tile_b is None:
        tile_b = _pick_tile_b(B)
    assert B % tile_b == 0 and (tile_b % 8 == 0 or tile_b == B), (B, tile_b)
    grid = (B // tile_b,)

    mxu_dt = jnp.bfloat16          # MXU inputs; accumulation stays f32
    f32 = jnp.float32

    # One-time parameter prep (cheap; in a serving loop cache these at weight-load time).
    w1p = jnp.zeros((IMG_DIM, HIDDEN_PAD), f32).at[:, :HIDDEN].set(w1.astype(f32)).astype(mxu_dt)
    b1p = jnp.zeros((1, HIDDEN_PAD), f32).at[:, :HIDDEN].set(b1.reshape(1, HIDDEN).astype(f32))
    w2p = jnp.zeros((HIDDEN_PAD, CTX_W), f32).at[:HIDDEN, :].set(w2.astype(f32)).astype(mxu_dt)
    b2p = b2.reshape(1, CTX_W).astype(f32)
    pre_flat = prefix.reshape(1, PRE_W).astype(out_dtype)
    suf_flat = suffix.reshape(1, SUF_W).astype(out_dtype)

    out_itemsize = jnp.dtype(out_dtype).itemsize
    flops = 2 * B * (IMG_DIM * HIDDEN_PAD + HIDDEN_PAD * CTX_W)
    bytes_accessed = (B * IMG_DIM * 2                          # img (bf16)
                      + (w1p.size + w2p.size) * 2              # weights (bf16)
                      + (b1p.size + b2p.size) * 4              # biases (f32)
                      + (pre_flat.size + suf_flat.size) * out_itemsize
                      + B * TOTAL_W * out_itemsize)            # full output write

    out2d = pl.pallas_call(
        _prompt_kernel,
        out_shape=jax.ShapeDtypeStruct((B, TOTAL_W), out_dtype),
        grid_spec=pltpu.PrefetchScalarGridSpec(
            num_scalar_prefetch=0,
            grid=grid,
            in_specs=[
                pl.BlockSpec((tile_b, IMG_DIM), lambda i: (i, 0)),      # img: batch-tiled
                pl.BlockSpec((IMG_DIM, HIDDEN_PAD), lambda i: (0, 0)),  # w1 (padded, bf16)
                pl.BlockSpec((1, HIDDEN_PAD), lambda i: (0, 0)),        # b1 (padded, f32)
                pl.BlockSpec((HIDDEN_PAD, CTX_W), lambda i: (0, 0)),    # w2 (padded, bf16)
                pl.BlockSpec((1, CTX_W), lambda i: (0, 0)),             # b2 (f32)
                pl.BlockSpec((1, PRE_W), lambda i: (0, 0)),             # prefix row (flat)
                pl.BlockSpec((1, SUF_W), lambda i: (0, 0)),             # suffix row (flat)
            ],
            out_specs=pl.BlockSpec((tile_b, TOTAL_W), lambda i: (i, 0)),
        ),
        compiler_params=pltpu.CompilerParams(
            dimension_semantics=("parallel",),
            vmem_limit_bytes=48 * 1024 * 1024,
        ),
        cost_estimate=pl.CostEstimate(flops=flops, transcendentals=0,
                                      bytes_accessed=bytes_accessed),
    )(img.astype(mxu_dt), w1p, b1p, w2p, b2p, pre_flat, suf_flat)

    return out2d.reshape(B, SEQ_LEN, CTX_DIM)   # free (row-major contiguous) reshape


def reference(img, w1, b1, w2, b2, prefix, suffix):
    B = img.shape[0]
    h = jnp.maximum(img @ w1 + b1, 0.0)
    ctx = (h @ w2 + b2).reshape(B, N_CLS_CTX, CTX_DIM)
    pre = jnp.broadcast_to(prefix[None], (B, N_PREFIX, CTX_DIM))
    suf = jnp.broadcast_to(suffix[None], (B, N_SUFFIX, CTX_DIM))
    return jnp.concatenate([pre, ctx, suf], axis=1)


if __name__ == "__main__":
    key = jax.random.PRNGKey(0)
    k_img, k_w1, k_b1, k_w2, k_b2, k_emb = jax.random.split(key, 6)

    B = 16  # small batch; default tile_b=8 -> 2-step batch-parallel pipelined grid
    img = jax.random.normal(k_img, (B, IMG_DIM), dtype=jnp.float32)
    w1 = jax.random.normal(k_w1, (IMG_DIM, HIDDEN), dtype=jnp.float32) * 0.02
    b1 = jax.random.normal(k_b1, (HIDDEN,), dtype=jnp.float32) * 0.02
    w2 = jax.random.normal(k_w2, (HIDDEN, CTX_DIM * N_CLS_CTX), dtype=jnp.float32) * 0.02
    b2 = jax.random.normal(k_b2, (CTX_DIM * N_CLS_CTX,), dtype=jnp.float32) * 0.02

    # synthetic token_embedding("A photo of a X X X X person.") -> (77, 512)
    embedding = jax.random.normal(k_emb, (SEQ_LEN, CTX_DIM), dtype=jnp.float32) * 0.02
    token_prefix = embedding[:N_PREFIX, :]                    # (5, 512)
    token_suffix = embedding[N_PREFIX + N_CLS_CTX:, :]        # (68, 512)

    prompts = conditional_prompt_learner(img, w1, b1, w2, b2, token_prefix, token_suffix)
    prompts = jax.block_until_ready(prompts)

    ref = reference(img, w1, b1, w2, b2, token_prefix, token_suffix)
    assert prompts.shape == (B, SEQ_LEN, CTX_DIM), prompts.shape
    # bf16 MXU inputs with f32 accumulation -> ~1% relative error on the 4 learned tokens.
    assert jnp.allclose(prompts, ref, atol=2e-2, rtol=2e-2), "mismatch vs reference"
    # prefix / suffix tokens are copied exactly
    assert jnp.array_equal(prompts[:, :N_PREFIX, :], ref[:, :N_PREFIX, :])
    assert jnp.array_equal(prompts[:, N_PREFIX + N_CLS_CTX:, :], ref[:, N_PREFIX + N_CLS_CTX:, :])

    print("KERNEL_OK")
</pallas_src>

<mosaic_0001>
module attributes {stable_mosaic.version = 11 : i64} {
  func.func @_prompt_kernel(%arg0: i32, %arg1: memref<8x768xbf16, #tpu.memory_space<vmem>>, %arg2: memref<768x128xbf16, #tpu.memory_space<vmem>>, %arg3: memref<1x128xf32, #tpu.memory_space<vmem>>, %arg4: memref<128x2048xbf16, #tpu.memory_space<vmem>>, %arg5: memref<1x2048xf32, #tpu.memory_space<vmem>>, %arg6: memref<1x2560xf32, #tpu.memory_space<vmem>>, %arg7: memref<1x34816xf32, #tpu.memory_space<vmem>>, %arg8: memref<8x39424xf32, #tpu.memory_space<vmem>>) attributes {dimension_semantics = [#tpu.dimension_semantics<parallel>], iteration_bounds = array<i64: 2>, scalar_prefetch = 0 : i64, scratch_operands = 0 : i64, tpu.core_type = #tpu.core_type<tc>, window_params = [{transform_indices = @transform_0, window_bounds = array<i64: 8, 768>}, {pipeline_mode = #tpu.pipeline_mode<synchronous>, transform_indices = @transform_1, window_bounds = array<i64: 768, 128>}, {pipeline_mode = #tpu.pipeline_mode<synchronous>, transform_indices = @transform_2, window_bounds = array<i64: 1, 128>}, {pipeline_mode = #tpu.pipeline_mode<synchronous>, transform_indices = @transform_3, window_bounds = array<i64: 128, 2048>}, {pipeline_mode = #tpu.pipeline_mode<synchronous>, transform_indices = @transform_4, window_bounds = array<i64: 1, 2048>}, {pipeline_mode = #tpu.pipeline_mode<synchronous>, transform_indices = @transform_5, window_bounds = array<i64: 1, 2560>}, {pipeline_mode = #tpu.pipeline_mode<synchronous>, transform_indices = @transform_6, window_bounds = array<i64: 1, 34816>}, {transform_indices = @transform_7, window_bounds = array<i64: 8, 39424>}]} {
    %c0 = arith.constant 0 : index
    %c0_0 = arith.constant 0 : index
    %0 = vector.load %arg1[%c0, %c0_0] : memref<8x768xbf16, #tpu.memory_space<vmem>>, vector<8x768xbf16>
    %c0_1 = arith.constant 0 : index
    %c0_2 = arith.constant 0 : index
    %1 = vector.load %arg2[%c0_1, %c0_2] : memref<768x128xbf16, #tpu.memory_space<vmem>>, vector<768x128xbf16>
    %cst = arith.constant dense<0.000000e+00> : vector<8x128xf32>
    %2 = tpu.matmul %0, %1, %cst {dimension_numbers = #tpu.dot_dimension_numbers<[1], [0], [0], [1], [0, 0, 1, 1], [], []>} : vector<8x768xbf16>, vector<768x128xbf16>, vector<8x128xf32> -> vector<8x128xf32>
    %c0_3 = arith.constant 0 : index
    %c0_4 = arith.constant 0 : index
    %3 = vector.load %arg3[%c0_3, %c0_4] : memref<1x128xf32, #tpu.memory_space<vmem>>, vector<1x128xf32>
    %4 = vector.broadcast %3 : vector<1x128xf32> to vector<8x128xf32>
    %5 = arith.addf %2, %4 : vector<8x128xf32>
    %cst_5 = arith.constant 0.000000e+00 : f32
    %6 = vector.broadcast %cst_5 : f32 to vector<8x128xf32>
    %7 = arith.maximumf %5, %6 : vector<8x128xf32>
    %8 = arith.truncf %7 : vector<8x128xf32> to vector<8x128xbf16>
    %c0_6 = arith.constant 0 : index
    %c0_7 = arith.constant 0 : index
    %9 = vector.load %arg4[%c0_6, %c0_7] : memref<128x2048xbf16, #tpu.memory_space<vmem>>, vector<128x2048xbf16>
    %cst_8 = arith.constant dense<0.000000e+00> : vector<8x2048xf32>
    %10 = tpu.matmul %8, %9, %cst_8 {dimension_numbers = #tpu.dot_dimension_numbers<[1], [0], [0], [1], [0, 0, 1, 1], [], []>} : vector<8x128xbf16>, vector<128x2048xbf16>, vector<8x2048xf32> -> vector<8x2048xf32>
    %c0_9 = arith.constant 0 : index
    %c0_10 = arith.constant 0 : index
    %11 = vector.load %arg5[%c0_9, %c0_10] : memref<1x2048xf32, #tpu.memory_space<vmem>>, vector<1x2048xf32>
    %12 = vector.broadcast %11 : vector<1x2048xf32> to vector<8x2048xf32>
    %13 = arith.addf %10, %12 : vector<8x2048xf32>
    %c0_11 = arith.constant 0 : index
    %c0_12 = arith.constant 0 : index
    %14 = vector.load %arg6[%c0_11, %c0_12] : memref<1x2560xf32, #tpu.memory_space<vmem>>, vector<1x2560xf32>
    %15 = vector.shape_cast %14 : vector<1x2560xf32> to vector<1x2560xf32>
    %16 = vector.broadcast %15 : vector<1x2560xf32> to vector<8x2560xf32>
    %c0_13 = arith.constant 0 : index
    %c0_14 = arith.constant 0 : index
    %17 = vector.load %arg8[%c0_13, %c0_14] : memref<8x39424xf32, #tpu.memory_space<vmem>>, vector<8x2560xf32>
    tpu.vector_store %arg8[%c0_13, %c0_14], %16 {strides = array<i32>} : memref<8x39424xf32, #tpu.memory_space<vmem>>, vector<8x2560xf32>,
    %c0_15 = arith.constant 0 : index
    %c2560 = arith.constant 2560 : index
    %18 = vector.load %arg8[%c0_15, %c2560] : memref<8x39424xf32, #tpu.memory_space<vmem>>, vector<8x2048xf32>
    tpu.vector_store %arg8[%c0_15, %c2560], %13 {strides = array<i32>} : memref<8x39424xf32, #tpu.memory_space<vmem>>, vector<8x2048xf32>,
    %c0_16 = arith.constant 0 : index
    %c0_17 = arith.constant 0 : index
    %19 = vector.load %arg7[%c0_16, %c0_17] : memref<1x34816xf32, #tpu.memory_space<vmem>>, vector<1x34816xf32>
    %20 = vector.shape_cast %19 : vector<1x34816xf32> to vector<1x34816xf32>
    %21 = vector.broadcast %20 : vector<1x34816xf32> to vector<8x34816xf32>
    %c0_18 = arith.constant 0 : index
    %c4608 = arith.constant 4608 : index
    %22 = vector.load %arg8[%c0_18, %c4608] : memref<8x39424xf32, #tpu.memory_space<vmem>>, vector<8x34816xf32>
    tpu.vector_store %arg8[%c0_18, %c4608], %21 {strides = array<i32>} : memref<8x39424xf32, #tpu.memory_space<vmem>>, vector<8x34816xf32>,
    return
  }
  func.func @transform_0(%arg0: i32) -> (i32, i32) {
    %c0_i32 = arith.constant 0 : i32
    %c0_i32_0 = arith.constant 0 : i32
    return %arg0, %c0_i32 : i32, i32
  }
  func.func @transform_1(%arg0: i32) -> (i32, i32) {
    %c0_i32 = arith.constant 0 : i32
    %c0_i32_0 = arith.constant 0 : i32
    %c0_i32_1 = arith.constant 0 : i32
    return %c0_i32, %c0_i32_0 : i32, i32
  }
  func.func @transform_2(%arg0: i32) -> (i32, i32) {
    %c0_i32 = arith.constant 0 : i32
    %c0_i32_0 = arith.constant 0 : i32
    %c0_i32_1 = arith.constant 0 : i32
    return %c0_i32, %c0_i32_0 : i32, i32
  }
  func.func @transform_3(%arg0: i32) -> (i32, i32) {
    %c0_i32 = arith.constant 0 : i32
    %c0_i32_0 = arith.constant 0 : i32
    %c0_i32_1 = arith.constant 0 : i32
    return %c0_i32, %c0_i32_0 : i32, i32
  }
  func.func @transform_4(%arg0: i32) -> (i32, i32) {
    %c0_i32 = arith.constant 0 : i32
    %c0_i32_0 = arith.constant 0 : i32
    %c0_i32_1 = arith.constant 0 : i32
    return %c0_i32, %c0_i32_0 : i32, i32
  }
  func.func @transform_5(%arg0: i32) -> (i32, i32) {
    %c0_i32 = arith.constant 0 : i32
    %c0_i32_0 = arith.constant 0 : i32
    %c0_i32_1 = arith.constant 0 : i32
    return %c0_i32, %c0_i32_0 : i32, i32
  }
  func.func @transform_6(%arg0: i32) -> (i32, i32) {
    %c0_i32 = arith.constant 0 : i32
    %c0_i32_0 = arith.constant 0 : i32
    %c0_i32_1 = arith.constant 0 : i32
    return %c0_i32, %c0_i32_0 : i32, i32
  }
  func.func @transform_7(%arg0: i32) -> (i32, i32) {
    %c0_i32 = arith.constant 0 : i32
    %c0_i32_0 = arith.constant 0 : i32
    return %arg0, %c0_i32 : i32, i32
  }
}

</mosaic_0001>

<bundles_post_ra>
// kernel: conditional_prompt_learner.1
= control target key start
LH: loop header
LB: loop body
LE: loop exit
PB: predicated region body
PF: predicated region fallthrough
CT: control target
= control target key end

     0   :  { %s3752_s24 = smov 0   ;;  %s5324_s0 = inlined_call_operand.vmem [shape: bf16[16,768], index: 0, kind: input, shape index: {}]   ;;  %s5325_s1 = inlined_call_operand.vmem [shape: bf16[768,128], index: 1, kind: input, shape index: {}]   ;;  %s5326_s2 = inlined_call_operand.vmem [shape: f32[1,128], index: 2, kind: input, shape index: {}]   ;;  %s5327_s3 = inlined_call_operand.vmem [shape: bf16[128,2048], index: 3, kind: input, shape index: {}]   ;;  %s5328_s4 = inlined_call_operand.vmem [shape: f32[1,2048], index: 4, kind: input, shape index: {}]   ;;  %s5329_s5 = inlined_call_operand.vmem [shape: f32[1,2560], index: 5, kind: input, shape index: {}]   ;;  %s5330_s6 = inlined_call_operand.vmem [shape: f32[1,34816], index: 6, kind: input, shape index: {}]   ;;  %s5331_s7 = inlined_call_operand.vmem [shape: f32[16,39424], index: 7, kind: output, shape index: {}]  }
   0x1 LB: > { %s2804_s25 = sadd.s32 4294967295, %s3710_s24   ;;  %p2808_p0 = scmp.ge.s32.totalorder %s3710_s24, 1  ;;  %s3710_s24 = sphi %s3752_s24, %s17_s24  }
   0x2   : > { %p237_p1 = scmp.lt.s32.totalorder %s3710_s24, 3 }
   0x4   : > { %p238_p2 = pnand %p2808_p0, %p237_p1 }
   0x5   : > { %p269_p3 = scmp.lt.s32.totalorder (!%p238_p2), %s2804_s25, 1 }
   0x6   : > { %241 = sbr.rel (%p238_p2) target bundleno = 436 (0x1b4), region = 48 }
   0xb   : > { %v3524_v0 = vld [vmem:[%s5325_s1 + $0x38] sm:$0xff]  ;;  %v3523_v2 = vld [vmem:[%s5325_s1 + $0x30] sm:$0xff]  ;;  %v3522_v8 = vld [vmem:[%s5325_s1 + $0x28] sm:$0xff]  ;;  %s5333_s25 = smov (!%p269_p3, %s2804_s25), 1 }
   0xc   : > { %v3532_v1 = vld [vmem:[%s5325_s1 + $0x78] sm:$0xff]  ;;  %691 = vmatpush.bf16.msra.mxu0 %v3524_v0  ;;  %v3531_v3 = vld [vmem:[%s5325_s1 + $0x70] sm:$0xff]  ;;  %v3530_v9 = vld [vmem:[%s5325_s1 + $0x68] sm:$0xff]  ;;  %s3694_s29 = smul.u32 2464, %s5333_s25 }
   0xd   : > { %704 = vmatpush.bf16.msra.mxu1 %v3532_v1  ;;  %v3540_v4 = vld [vmem:[%s5325_s1 + $0xb8] sm:$0xff]  ;;  %v3539_v6 = vld [vmem:[%s5325_s1 + $0xb0] sm:$0xff]  ;;  %v3538_v10 = vld [vmem:[%s5325_s1 + $0xa8] sm:$0xff]  ;;  %s3693_s26 = smul.u32 24, %s5333_s25 }
   0xe   : > { %v3548_v5 = vld [vmem:[%s5325_s1 + $0xf8] sm:$0xff]  ;;  %717 = vmatpush.bf16.msra.mxu2 %v3540_v4  ;;  %v3547_v7 = vld [vmem:[%s5325_s1 + $0xf0] sm:$0xff]  ;;  %v3546_v11 = vld [vmem:[%s5325_s1 + $0xe8] sm:$0xff]  ;;  %s3817_s19 = scalar_lea.vmem %s5331_s7, %s3694_s29 }
   0xf   : > { %730 = vmatpush.bf16.msra.mxu3 %v3548_v5  ;;  %v3521_v12 = vld [vmem:[%s5325_s1 + $0x20] sm:$0xff]  ;;  %v3520_v21 = vld [vmem:[%s5325_s1 + $0x18] sm:$0xff]  ;;  %v3830_v24 = vld [vmem:[%s5329_s5 + $0x8] sm:$0xff]  ;;  %s3852_s15 = scalar_lea.vmem %s5324_s0, %s3693_s26 }
  0x10   : > { %692 = vmatpush.bf16.msra.mxu0 %v3523_v2  ;;  %v3529_v13 = vld [vmem:[%s5325_s1 + $0x60] sm:$0xff]  ;;  %v3528_v22 = vld [vmem:[%s5325_s1 + $0x58] sm:$0xff]  ;;  %v3519_v30 = vld [vmem:[%s5325_s1 + $0x10] sm:$0xff]  ;;  %v1797_v32 = vperm.slane %v3830_v24, 0  ;;  %v1798_v33 = vperm.slane %v3830_v24, 1  ;;  %v1799_v35 = vperm.slane %v3830_v24, 2 }
  0x11   : > { %705 = vmatpush.bf16.msra.mxu1 %v3531_v3  ;;  %v1783_v14 = vld [vmem:[%s5329_s5] sm:$0xff]  ;;  %v3536_v26 = vld [vmem:[%s5325_s1 + $0x98] sm:$0xff]  ;;  %v3527_v31 = vld [vmem:[%s5325_s1 + $0x50] sm:$0xff]  ;;  %v1800_v37 = vperm.slane %v3830_v24, 3  ;;  %v1801_v41 = vperm.slane %v3830_v24, 4  ;;  %v1802_v43 = vperm.slane %v3830_v24, 5 }
  0x12   : > { %718 = vmatpush.bf16.msra.mxu2 %v3539_v6  ;;  %v3537_v15 = vld [vmem:[%s5325_s1 + $0xa0] sm:$0xff]  ;;  %v1789_v16 = vperm.slane %v1783_v14, 0  ;;  %v1790_v17 = vperm.slane %v1783_v14, 1  ;;  %v1791_v18 = vperm.slane %v1783_v14, 2  ;;  %v1792_v20 = vperm.slane %v1783_v14, 3  ;;  %v3544_v28 = vld [vmem:[%s5325_s1 + $0xd8] sm:$0xff] }
  0x13   : > { %731 = vmatpush.bf16.msra.mxu3 %v3547_v7  ;;  %v3545_v19 = vld [vmem:[%s5325_s1 + $0xe0] sm:$0xff]  ;;  %v1793_v23 = vperm.slane %v1783_v14, 4  ;;  %v1794_v25 = vperm.slane %v1783_v14, 5  ;;  %v1795_v27 = vperm.slane %v1783_v14, 6  ;;  %v1796_v29 = vperm.slane %v1783_v14, 7  ;;  %v3535_v34 = vld [vmem:[%s5325_s1 + $0x90] sm:$0xff] }
  0x14   : > { %693 = vmatpush.bf16.msra.mxu0 %v3522_v8  ;;  %1829 = vst [vmem:[%s3817_s19] sm:$0xff] %v1789_v16  ;;  %v3543_v36 = vld [vmem:[%s5325_s1 + $0xd0] sm:$0xff]  ;;  %v3518_v38 = vld [vmem:[%s5325_s1 + $0x8] sm:$0xff]  ;;  %v279_v40 = vld [vmem:[%s3852_s15] sm:$0xff]  ;;  %v1803_v45 = vperm.slane %v3830_v24, 6  ;;  %v1804_v47 = vperm.slane %v3830_v24, 7 }
  0x15   : > { %706 = vmatpush.bf16.msra.mxu1 %v3530_v9  ;;  %1830 = vst [vmem:[%s3817_s19 + $0x8] sm:$0xff] %v1790_v17  ;;  %v3526_v39 = vld [vmem:[%s5325_s1 + $0x48] sm:$0xff]  ;;  %v1785_v42 = vld [vmem:[%s5329_s5 + $0x10] sm:$0xf]  ;;  %v385_v46 = vunpack.c.l.b16 %v279_v40  ;;  %v386_v48 = vunpack.c.h.b16 %v279_v40  ;;  %v3517_v49 = vld [vmem:[%s5325_s1] sm:$0xff] }
  0x16   : > { %719 = vmatpush.bf16.msra.mxu2 %v3538_v10  ;;  %1831 = vst [vmem:[%s3817_s19 + $0x10] sm:$0xff] %v1791_v18  ;;  %v3534_v44 = vld [vmem:[%s5325_s1 + $0x88] sm:$0xff]  ;;  %v3525_v50 = vld [vmem:[%s5325_s1 + $0x40] sm:$0xff]  ;;  %v1805_v51 = vperm.slane %v1785_v42, 0  ;;  %v3556_v53 = vld [vmem:[%s5325_s1 + $0x138] sm:$0xff]  ;;  %v1806_v55 = vperm.slane %v1785_v42, 1 }
  0x17   : > { %732 = vmatpush.bf16.msra.mxu3 %v3546_v11  ;;  %1832 = vst [vmem:[%s3817_s19 + $0x18] sm:$0xff] %v1792_v20  ;;  %v3542_v52 = vld [vmem:[%s5325_s1 + $0xc8] sm:$0xff]  ;;  %v3564_v54 = vld [vmem:[%s5325_s1 + $0x178] sm:$0xff]  ;;  %v1865_v56 = vld [vmem:[%s5330_s6] sm:$0xff]  ;;  %v1807_v57 = vperm.slane %v1785_v42, 2  ;;  %v391_v58 = vpack.c.b16 %v385_v46, %v385_v46  ;;  %v1808_v59 = vperm.slane %v1785_v42, 3  ;;  %v392_v60 = vpack.c.b16 %v386_v48, %v386_v48 }
  0x18   : > { %694 = vmatpush.bf16.msra.mxu0 %v3521_v12  ;;  %1833 = vst [vmem:[%s3817_s19 + $0x20] sm:$0xff] %v1793_v23  ;;  %v3533_v61 = vld [vmem:[%s5325_s1 + $0x80] sm:$0xff]  ;;  %v1933_v62 = vperm.slane %v1865_v56, 0  ;;  %v3555_v0 = vld [vmem:[%s5325_s1 + $0x130] sm:$0xff]  ;;  %v1934_v2 = vperm.slane %v1865_v56, 1  ;;  %v1935_v3 = vperm.slane %v1865_v56, 2 }
  0x19   : > { %707 = vmatpush.bf16.msra.mxu1 %v3529_v13  ;;  %1834 = vst [vmem:[%s3817_s19 + $0x28] sm:$0xff] %v1794_v25  ;;  %v3541_v63 = vld [vmem:[%s5325_s1 + $0xc0] sm:$0xff]  ;;  %v3563_v1 = vld [vmem:[%s5325_s1 + $0x170] sm:$0xff]  ;;  %v1936_v4 = vperm.slane %v1865_v56, 3  ;;  %v1937_v5 = vperm.slane %v1865_v56, 4  ;;  %v1866_v6 = vld [vmem:[%s5330_s6 + $0x8] sm:$0xff] }
  0x1a   : > { %720 = vmatpush.bf16.msra.mxu2 %v3537_v15  ;;  %1835 = vst [vmem:[%s3817_s19 + $0x30] sm:$0xff] %v1795_v27  ;;  %v1938_v7 = vperm.slane %v1865_v56, 5  ;;  %v3554_v8 = vld [vmem:[%s5325_s1 + $0x128] sm:$0xff]  ;;  %v1939_v10 = vperm.slane %v1865_v56, 6  ;;  %v1940_v11 = vperm.slane %v1865_v56, 7  ;;  %v1941_v12 = vperm.slane %v1866_v6, 0 }
  0x1b   : > { %733 = vmatpush.bf16.msra.mxu3 %v3545_v19  ;;  %1836 = vst [vmem:[%s3817_s19 + $0x38] sm:$0xff] %v1796_v29  ;;  %v3562_v9 = vld [vmem:[%s5325_s1 + $0x168] sm:$0xff]  ;;  %v1942_v13 = vperm.slane %v1866_v6, 1  ;;  %v3553_v14 = vld [vmem:[%s5325_s1 + $0x120] sm:$0xff]  ;;  %v1943_v16 = vperm.slane %v1866_v6, 2  ;;  %v1944_v17 = vperm.slane %v1866_v6, 3 }
  0x1c   : > { %695 = vmatpush.bf16.msra.mxu0 %v3520_v21  ;;  %1837 = vst [vmem:[%s3817_s19 + $0x40] sm:$0xff] %v1797_v32  ;;  %v3561_v15 = vld [vmem:[%s5325_s1 + $0x160] sm:$0xff]  ;;  %v1945_v18 = vperm.slane %v1866_v6, 4  ;;  %v1867_v19 = vld [vmem:[%s5330_s6 + $0x10] sm:$0xff]  ;;  %v1946_v20 = vperm.slane %v1866_v6, 5  ;;  %v1947_v21 = vperm.slane %v1866_v6, 6 }
  0x1d   : > { %708 = vmatpush.bf16.msra.mxu1 %v3528_v22  ;;  %1838 = vst [vmem:[%s3817_s19 + $0x48] sm:$0xff] %v1798_v33  ;;  %v1948_v22 = vperm.slane %v1866_v6, 7  ;;  %v1949_v23 = vperm.slane %v1867_v19, 0  ;;  %v1950_v24 = vperm.slane %v1867_v19, 1  ;;  %v1951_v25 = vperm.slane %v1867_v19, 2  ;;  %v3552_v42 = vld [vmem:[%s5325_s1 + $0x118] sm:$0xff] }
  0x1e   : > { %721 = vmatpush.bf16.msra.mxu2 %v3536_v26  ;;  %1839 = vst [vmem:[%s3817_s19 + $0x50] sm:$0xff] %v1799_v35  ;;  %v1952_v26 = vperm.slane %v1867_v19, 3  ;;  %v1953_v27 = vperm.slane %v1867_v19, 4  ;;  %v1954_v29 = vperm.slane %v1867_v19, 5  ;;  %v3551_v48 = vld [vmem:[%s5325_s1 + $0x110] sm:$0xff] }
  0x1f   : > { %734 = vmatpush.bf16.msra.mxu3 %v3544_v28  ;;  %1840 = vst [vmem:[%s3817_s19 + $0x58] sm:$0xff] %v1800_v37  ;;  %v1868_v28 = vld [vmem:[%s5330_s6 + $0x18] sm:$0xff]  ;;  %v1869_v37 = vld [vmem:[%s5330_s6 + $0x20] sm:$0xff] }
  0x20   : > { %696 = vmatpush.bf16.msra.mxu0 %v3519_v30  ;;  %1841 = vst [vmem:[%s3817_s19 + $0x60] sm:$0xff] %v1801_v41  ;;  %v1955_v30 = vperm.slane %v1867_v19, 6  ;;  %v1957_v32 = vperm.slane %v1868_v28, 0  ;;  %v1958_v33 = vperm.slane %v1868_v28, 1  ;;  %v1960_v35 = vperm.slane %v1868_v28, 3 }
  0x21   : > { %709 = vmatpush.bf16.msra.mxu1 %v3527_v31  ;;  %1842 = vst [vmem:[%s3817_s19 + $0x68] sm:$0xff] %v1802_v43  ;;  %v1956_v31 = vperm.slane %v1867_v19, 7  ;;  %v1964_v40 = vperm.slane %v1868_v28, 7  ;;  %v1965_v41 = vperm.slane %v1869_v37, 0  ;;  %v1966_v43 = vperm.slane %v1869_v37, 1 }
  0x22   : > { %722 = vmatpush.bf16.msra.mxu2 %v3535_v34  ;;  %1843 = vst [vmem:[%s3817_s19 + $0x70] sm:$0xff] %v1803_v45  ;;  %v1959_v34 = vperm.slane %v1868_v28, 2  ;;  %v1967_v45 = vperm.slane %v1869_v37, 2  ;;  %v1968_v46 = vperm.slane %v1869_v37, 3 }
  0x23   : > { %735 = vmatpush.bf16.msra.mxu3 %v3543_v36  ;;  %1844 = vst [vmem:[%s3817_s19 + $0x78] sm:$0xff] %v1804_v47  ;;  %v1961_v36 = vperm.slane %v1868_v28, 4  ;;  %v1969_v47 = vperm.slane %v1869_v37, 4 }
  0x24   : > { %697 = vmatpush.bf16.msra.mxu0 %v3518_v38  ;;  %1845 = vst [vmem:[%s3817_s19 + $0x80] sm:$0xff] %v1805_v51  ;;  %v1962_v38 = vperm.slane %v1868_v28, 5  ;;  %v3559_v51 = vld [vmem:[%s5325_s1 + $0x150] sm:$0xff] }
  0x25   : > { %710 = vmatpush.bf16.msra.mxu1 %v3526_v39  ;;  %1846 = vst [vmem:[%s3817_s19 + $0x88] sm:$0xff] %v1806_v55  ;;  %v1963_v39 = vperm.slane %v1868_v28, 6  ;;  %v3550_v55 = vld [vmem:[%s5325_s1 + $0x108] sm:$0xff] }
  0x26   : > { %723 = vmatpush.bf16.msra.mxu2 %v3534_v44  ;;  %1847 = vst [vmem:[%s3817_s19 + $0x90] sm:$0xff] %v1807_v57  ;;  %v3560_v44 = vld [vmem:[%s5325_s1 + $0x158] sm:$0xff]  ;;  %v3558_v57 = vld [vmem:[%s5325_s1 + $0x148] sm:$0xff] }
  0x27   : > { %736 = vmatpush.bf16.msra.mxu3 %v3542_v52  ;;  %1848 = vst [vmem:[%s3817_s19 + $0x98] sm:$0xff] %v1808_v59  ;;  %v1971_v52 = vperm.slane %v1869_v37, 6 }
  0x28   : > { %698 = vmatpush.bf16.msra.mxu0 %v3517_v49  ;;  %2477 = vst [vmem:[%s3817_s19 + $0x120] sm:$0xff] %v1933_v62  ;;  %v1870_v49 = vld [vmem:[%s5330_s6 + $0x28] sm:$0xff]  ;;  %v1871_v62 = vld [vmem:[%s5330_s6 + $0x30] sm:$0xff] }
  0x29   : > { %711 = vmatpush.bf16.msra.mxu1 %v3525_v50  ;;  %2478 = vst [vmem:[%s3817_s19 + $0x128] sm:$0xff] %v1934_v2  ;;  %v1970_v50 = vperm.slane %v1869_v37, 5  ;;  %v1974_v56 = vperm.slane %v1870_v49, 1  ;;  %v1976_v59 = vperm.slane %v1870_v49, 3  ;;  %v1980_v2 = vperm.slane %v1870_v49, 7 }
  0x2a   : > { %724 = vmatpush.bf16.msra.mxu2 %v3533_v61  ;;  %2479 = vst [vmem:[%s3817_s19 + $0x130] sm:$0xff] %v1935_v3  ;;  %v3549_v61 = vld [vmem:[%s5325_s1 + $0x100] sm:$0xff]  ;;  %v1981_v3 = vperm.slane %v1871_v62, 0  ;;  %v1984_v6 = vperm.slane %v1871_v62, 3 }
  0x2b   : > { %699 = vmatmul.bf16.vlgmr.msra.gmra.mxu0 %v391_v58  ;;  %737 = vmatpush.bf16.msra.mxu3 %v3541_v63  ;;  %2480 = vst [vmem:[%s3817_s19 + $0x138] sm:$0xff] %v1936_v4  ;;  %v1975_v58 = vperm.slane %v1870_v49, 2  ;;  %v1978_v63 = vperm.slane %v1870_v49, 5  ;;  %v1982_v4 = vperm.slane %v1871_v62, 1 }
  0x2c   : > { %743 = vmatpush.bf16.msrb.mxu0 %v3556_v53  ;;  %712 = vmatmul.bf16.vlgmr.msra.gmra.mxu1 %v392_v60  ;;  %2481 = vst [vmem:[%s3817_s19 + $0x140] sm:$0xff] %v1937_v5  ;;  %v1972_v53 = vperm.slane %v1869_v37, 7  ;;  %v1977_v60 = vperm.slane %v1870_v49, 4  ;;  %v1983_v5 = vperm.slane %v1871_v62, 2 }
  0x2d   : > { %756 = vmatpush.bf16.msrb.mxu1 %v3564_v54  ;;  %2482 = vst [vmem:[%s3817_s19 + $0x148] sm:$0xff] %v1938_v7  ;;  %v1973_v54 = vperm.slane %v1870_v49, 0  ;;  %v1985_v7 = vperm.slane %v1871_v62, 4 }
  0x2e   : > { %2483 = vst [vmem:[%s3817_s19 + $0x150] sm:$0xff] %v1939_v10  ;;  %v1987_v10 = vperm.slane %v1871_v62, 6 }
  0x2f   : > { %2484 = vst [vmem:[%s3817_s19 + $0x158] sm:$0xff] %v1940_v11  ;;  %v1988_v11 = vperm.slane %v1871_v62, 7 }
  0x30   : > { %744 = vmatpush.bf16.msrb.mxu0 %v3555_v0  ;;  %2485 = vst [vmem:[%s3817_s19 + $0x160] sm:$0xff] %v1941_v12  ;;  %v3557_v0 = vld [vmem:[%s5325_s1 + $0x140] sm:$0xff] }
  0x31   : > { %757 = vmatpush.bf16.msrb.mxu1 %v3563_v1  ;;  %2486 = vst [vmem:[%s3817_s19 + $0x168] sm:$0xff] %v1942_v13  ;;  %v1979_v1 = vperm.slane %v1870_v49, 6  ;;  %v280_v13 = vld [vmem:[%s3852_s15 + $0x8] sm:$0xff] }
  0x32   : > { %2487 = vst [vmem:[%s3817_s19 + $0x170] sm:$0xff] %v1943_v16 }
  0x33   : > { %2488 = vst [vmem:[%s3817_s19 + $0x178] sm:$0xff] %v1944_v17 }
  0x34   : > { %745 = vmatpush.bf16.msrb.mxu0 %v3554_v8  ;;  %2489 = vst [vmem:[%s3817_s19 + $0x180] sm:$0xff] %v1945_v18  ;;  %v1872_v8 = vld [vmem:[%s5330_s6 + $0x38] sm:$0xff]  ;;  %v387_v18 = vunpack.c.l.b16 %v280_v13 }
  0x35   : > { %758 = vmatpush.bf16.msrb.mxu1 %v3562_v9  ;;  %2490 = vst [vmem:[%s3817_s19 + $0x188] sm:$0xff] %v1946_v20  ;;  %v1986_v9 = vperm.slane %v1871_v62, 5  ;;  %v1989_v12 = vperm.slane %v1872_v8, 0  ;;  %v1991_v16 = vperm.slane %v1872_v8, 2  ;;  %v1992_v17 = vperm.slane %v1872_v8, 3 }
  0x36   : > { %2491 = vst [vmem:[%s3817_s19 + $0x190] sm:$0xff] %v1947_v21  ;;  %v1993_v19 = vperm.slane %v1872_v8, 4  ;;  %v388_v20 = vunpack.c.h.b16 %v280_v13 }
  0x37   : > { %2492 = vst [vmem:[%s3817_s19 + $0x198] sm:$0xff] %v1948_v22 }
  0x38   : > { %746 = vmatpush.bf16.msrb.mxu0 %v3553_v14  ;;  %2493 = vst [vmem:[%s3817_s19 + $0x1a0] sm:$0xff] %v1949_v23  ;;  %v1990_v14 = vperm.slane %v1872_v8, 1  ;;  %v1873_v23 = vld [vmem:[%s5330_s6 + $0x40] sm:$0xff] }
  0x39   : > { %759 = vmatpush.bf16.msrb.mxu1 %v3561_v15  ;;  %2494 = vst [vmem:[%s3817_s19 + $0x1a8] sm:$0xff] %v1950_v24  ;;  %v281_v15 = vld [vmem:[%s3852_s15 + $0x10] sm:$0xff]  ;;  %v1994_v24 = vperm.slane %v1872_v8, 5  ;;  %v2002_v37 = vperm.slane %v1873_v23, 5 }
  0x3a   : > { %2495 = vst [vmem:[%s3817_s19 + $0x1b0] sm:$0xff] %v1951_v25  ;;  %v389_v21 = vunpack.c.l.b16 %v281_v15  ;;  %v390_v22 = vunpack.c.h.b16 %v281_v15  ;;  %v393_v25 = vpack.c.b16 %v387_v18, %v387_v18 }
  0x3b   : > { %2496 = vst [vmem:[%s3817_s19 + $0x1b8] sm:$0xff] %v1952_v26  ;;  %v1995_v26 = vperm.slane %v1872_v8, 6 }
  0x3c   : > { %2497 = vst [vmem:[%s3817_s19 + $0x1c0] sm:$0xff] %v1953_v27  ;;  %747 = vmatpush.bf16.msrb.mxu0 %v3552_v42  ;;  %v394_v27 = vpack.c.b16 %v388_v20, %v388_v20  ;;  %v395_v28 = vpack.c.b16 %v389_v21, %v389_v21  ;;  %725 = vmatmul.bf16.vlgmr.msra.gmra.mxu2 %v393_v25 }
  0x3d   : > { %2498 = vst [vmem:[%s3817_s19 + $0x1c8] sm:$0xff] %v1954_v29  ;;  %760 = vmatpush.bf16.msrb.mxu1 %v3560_v44  ;;  %v396_v29 = vpack.c.b16 %v390_v22, %v390_v22 }
  0x3e   : > { %2499 = vst [vmem:[%s3817_s19 + $0x1d0] sm:$0xff] %v1955_v30  ;;  %v1996_v30 = vperm.slane %v1872_v8, 7  ;;  %738 = vmatmul.bf16.vlgmr.msra.gmra.mxu3 %v394_v27  ;;  %v1878_v8 = vld [vmem:[%s5330_s6 + $0x68] sm:$0xff] }
  0x3f   : > { %2500 = vst [vmem:[%s3817_s19 + $0x1d8] sm:$0xff] %v1956_v31  ;;  %v1997_v31 = vperm.slane %v1873_v23, 0  ;;  %v2038_v13 = vperm.slane %v1878_v8, 1  ;;  %v2040_v15 = vperm.slane %v1878_v8, 3  ;;  %v2042_v18 = vperm.slane %v1878_v8, 5 }
  0x40   : > { %2501 = vst [vmem:[%s3817_s19 + $0x1e0] sm:$0xff] %v1957_v32  ;;  %748 = vmatpush.bf16.msrb.mxu0 %v3551_v48  ;;  %v1998_v32 = vperm.slane %v1873_v23, 1  ;;  %v2044_v20 = vperm.slane %v1878_v8, 7 }
  0x41   : > { %2502 = vst [vmem:[%s3817_s19 + $0x1e8] sm:$0xff] %v1958_v33  ;;  %761 = vmatpush.bf16.msrb.mxu1 %v3559_v51  ;;  %v1999_v33 = vperm.slane %v1873_v23, 2 }
  0x42   : > { %2503 = vst [vmem:[%s3817_s19 + $0x1f0] sm:$0xff] %v1959_v34  ;;  %v2000_v34 = vperm.slane %v1873_v23, 3 }
  0x43   : > { %2504 = vst [vmem:[%s3817_s19 + $0x1f8] sm:$0xff] %v1960_v35  ;;  %v2001_v35 = vperm.slane %v1873_v23, 4 }
  0x44   : > { %2505 = vst [vmem:[%s3817_s19 + $0x200] sm:$0xff] %v1961_v36  ;;  %749 = vmatpush.bf16.msrb.mxu0 %v3550_v55  ;;  %v1874_v36 = vld [vmem:[%s5330_s6 + $0x48] sm:$0xff] }
  0x45   : > { %2506 = vst [vmem:[%s3817_s19 + $0x208] sm:$0xff] %v1962_v38  ;;  %762 = vmatpush.bf16.msrb.mxu1 %v3558_v57  ;;  %v2003_v38 = vperm.slane %v1873_v23, 6  ;;  %v2007_v42 = vperm.slane %v1874_v36, 2  ;;  %v2009_v44 = vperm.slane %v1874_v36, 4  ;;  %v2012_v48 = vperm.slane %v1874_v36, 7 }
  0x46   : > { %2507 = vst [vmem:[%s3817_s19 + $0x210] sm:$0xff] %v1963_v39  ;;  %v2004_v39 = vperm.slane %v1873_v23, 7 }
  0x47   : > { %2508 = vst [vmem:[%s3817_s19 + $0x218] sm:$0xff] %v1964_v40  ;;  %v2005_v40 = vperm.slane %v1874_v36, 0 }
  0x48   : > { %2509 = vst [vmem:[%s3817_s19 + $0x220] sm:$0xff] %v1965_v41  ;;  %750 = vmatpush.bf16.msrb.mxu0 %v3549_v61  ;;  %v2006_v41 = vperm.slane %v1874_v36, 1 }
  0x49   : > { %2510 = vst [vmem:[%s3817_s19 + $0x228] sm:$0xff] %v1966_v43  ;;  %763 = vmatpush.bf16.msrb.mxu1 %v3557_v0  ;;  %v2008_v43 = vperm.slane %v1874_v36, 3 }
  0x4a   : > { %2511 = vst [vmem:[%s3817_s19 + $0x230] sm:$0xff] %v1967_v45  ;;  %v1875_v45 = vld [vmem:[%s5330_s6 + $0x50] sm:$0xff] }
  0x4b   : > { %2512 = vst [vmem:[%s3817_s19 + $0x238] sm:$0xff] %v1968_v46  ;;  %751 = vmatmul.bf16.vlgmr.msrb.gmra.mxu0 %v395_v28  ;;  %v2010_v46 = vperm.slane %v1874_v36, 5  ;;  %v2013_v49 = vperm.slane %v1875_v45, 0  ;;  %v2015_v51 = vperm.slane %v1875_v45, 2  ;;  %v2018_v55 = vperm.slane %v1875_v45, 5 }
  0x4c   : > { %2513 = vst [vmem:[%s3817_s19 + $0x240] sm:$0xff] %v1969_v47  ;;  %764 = vmatmul.bf16.vlgmr.msrb.gmra.mxu1 %v396_v29  ;;  %v2011_v47 = vperm.slane %v1874_v36, 6  ;;  %v2020_v57 = vperm.slane %v1875_v45, 7 }
  0x4d   : > { %2514 = vst [vmem:[%s3817_s19 + $0x248] sm:$0xff] %v1970_v50  ;;  %v2014_v50 = vperm.slane %v1875_v45, 1 }
  0x4e   : > { %2515 = vst [vmem:[%s3817_s19 + $0x250] sm:$0xff] %v1971_v52  ;;  %v2016_v52 = vperm.slane %v1875_v45, 3 }
  0x4f   : > { %2516 = vst [vmem:[%s3817_s19 + $0x258] sm:$0xff] %v1972_v53  ;;  %v2017_v53 = vperm.slane %v1875_v45, 4 }
  0x50   : > { %2517 = vst [vmem:[%s3817_s19 + $0x260] sm:$0xff] %v1973_v54  ;;  %v1876_v54 = vld [vmem:[%s5330_s6 + $0x58] sm:$0xff] }
  0x51   : > { %2518 = vst [vmem:[%s3817_s19 + $0x268] sm:$0xff] %v1974_v56  ;;  %v2019_v56 = vperm.slane %v1875_v45, 6  ;;  %v2024_v61 = vperm.slane %v1876_v54, 3  ;;  %v2025_v62 = vperm.slane %v1876_v54, 4  ;;  %v2026_v0 = vperm.slane %v1876_v54, 5 }
  0x52   : > { %2519 = vst [vmem:[%s3817_s19 + $0x270] sm:$0xff] %v1975_v58  ;;  %v2021_v58 = vperm.slane %v1876_v54, 0 }
  0x53   : > { %2520 = vst [vmem:[%s3817_s19 + $0x278] sm:$0xff] %v1976_v59  ;;  %v2022_v59 = vperm.slane %v1876_v54, 1 }
  0x54   : > { %2521 = vst [vmem:[%s3817_s19 + $0x280] sm:$0xff] %v1977_v60  ;;  %v2023_v60 = vperm.slane %v1876_v54, 2 }
  0x55   : > { %2522 = vst [vmem:[%s3817_s19 + $0x288] sm:$0xff] %v1978_v63  ;;  %v1877_v63 = vld [vmem:[%s5330_s6 + $0x60] sm:$0xff] }
  0x56   : > { %2523 = vst [vmem:[%s3817_s19 + $0x290] sm:$0xff] %v1979_v1  ;;  %v2027_v1 = vperm.slane %v1876_v54, 6 }
  0x57   : > { %2524 = vst [vmem:[%s3817_s19 + $0x298] sm:$0xff] %v1980_v2  ;;  %v2028_v2 = vperm.slane %v1876_v54, 7  ;;  %v3661_v54 = vld [vmem:[%s5327_s3 + $0x304] sm:$0xf] }
  0x58   : > { %2525 = vst [vmem:[%s3817_s19 + $0x2a0] sm:$0xff] %v1981_v3  ;;  %v2029_v3 = vperm.slane %v1877_v63, 0 }
  0x59   : > { %2526 = vst [vmem:[%s3817_s19 + $0x2a8] sm:$0xff] %v1982_v4  ;;  %v2030_v4 = vperm.slane %v1877_v63, 1 }
  0x5a   : > { %2527 = vst [vmem:[%s3817_s19 + $0x2b0] sm:$0xff] %v1983_v5  ;;  %v2031_v5 = vperm.slane %v1877_v63, 2 }
  0x5b   : > { %2528 = vst [vmem:[%s3817_s19 + $0x2b8] sm:$0xff] %v1984_v6  ;;  %v2032_v6 = vperm.slane %v1877_v63, 3 }
  0x5c   : > { %2529 = vst [vmem:[%s3817_s19 + $0x2c0] sm:$0xff] %v1985_v7  ;;  %v2033_v7 = vperm.slane %v1877_v63, 4 }
  0x5d   : > { %2530 = vst [vmem:[%s3817_s19 + $0x2c8] sm:$0xff] %v1986_v9  ;;  %v2034_v9 = vperm.slane %v1877_v63, 5 }
  0x5e   : > { %2531 = vst [vmem:[%s3817_s19 + $0x2d0] sm:$0xff] %v1987_v10  ;;  %v2035_v10 = vperm.slane %v1877_v63, 6 }
  0x5f   : > { %2532 = vst [vmem:[%s3817_s19 + $0x2d8] sm:$0xff] %v1988_v11  ;;  %v2036_v11 = vperm.slane %v1877_v63, 7  ;;  %v3399_v63 = vld [vmem:[%s5327_s3 + $0x348] sm:$0xf0] }
  0x60   : > { %2533 = vst [vmem:[%s3817_s19 + $0x2e0] sm:$0xff] %v1989_v12  ;;  %v2037_v12 = vperm.slane %v1878_v8, 0 }
  0x61   : > { %2534 = vst [vmem:[%s3817_s19 + $0x2e8] sm:$0xff] %v1990_v14  ;;  %v2039_v14 = vperm.slane %v1878_v8, 2 }
  0x62   : > { %2535 = vst [vmem:[%s3817_s19 + $0x2f0] sm:$0xff] %v1991_v16  ;;  %v2041_v16 = vperm.slane %v1878_v8, 4 }
  0x63   : > { %2536 = vst [vmem:[%s3817_s19 + $0x2f8] sm:$0xff] %v1992_v17  ;;  %v1879_v17 = vld [vmem:[%s5330_s6 + $0x70] sm:$0xff] }
  0x64   : > { %2537 = vst [vmem:[%s3817_s19 + $0x300] sm:$0xff] %v1993_v19  ;;  %v2043_v19 = vperm.slane %v1878_v8, 6  ;;  %v2045_v21 = vperm.slane %v1879_v17, 0  ;;  %v2046_v22 = vperm.slane %v1879_v17, 1  ;;  %v2047_v23 = vperm.slane %v1879_v17, 2 }
  0x65   : > { %2538 = vst [vmem:[%s3817_s19 + $0x308] sm:$0xff] %v1994_v24  ;;  %v2048_v24 = vperm.slane %v1879_v17, 3  ;;  %v2049_v25 = vperm.slane %v1879_v17, 4  ;;  %v2050_v27 = vperm.slane %v1879_v17, 5  ;;  %v2051_v28 = vperm.slane %v1879_v17, 6 }
  0x66   : > { %2539 = vst [vmem:[%s3817_s19 + $0x310] sm:$0xff] %v1995_v26  ;;  %v4121_v26 = vld [vmem:[%s5330_s6 + $0x78] sm:$0xff]  ;;  %v2052_v29 = vperm.slane %v1879_v17, 7  ;;  %v3327_v8 = vld [vmem:[%s5327_s3 + $0x2c0] sm:$0xf0] }
  0x67   : > { %2540 = vst [vmem:[%s3817_s19 + $0x318] sm:$0xff] %v1996_v30  ;;  %v2053_v30 = vperm.slane %v4121_v26, 0  ;;  %v2056_v36 = vperm.slane %v4121_v26, 3 }
  0x68   : > { %2541 = vst [vmem:[%s3817_s19 + $0x320] sm:$0xff] %v1997_v31  ;;  %v2054_v31 = vperm.slane %v4121_v26, 1 }
  0x69   : > { %2542 = vst [vmem:[%s3817_s19 + $0x328] sm:$0xff] %v1998_v32  ;;  %v2055_v32 = vperm.slane %v4121_v26, 2 }
  0x6a   : > { %2543 = vst [vmem:[%s3817_s19 + $0x330] sm:$0xff] %v1999_v33  ;;  %v3453_v33 = vld [vmem:[%s5327_s3 + $0x380] sm:$0xf] }
  0x6b   : > { %2544 = vst [vmem:[%s3817_s19 + $0x338] sm:$0xff] %v2000_v34  ;;  %v3685_v34 = vld [vmem:[%s5327_s3 + $0x3bc] sm:$0xf0] }
  0x6c   : > { %2545 = vst [vmem:[%s3817_s19 + $0x340] sm:$0xff] %v2001_v35  ;;  %v4141_v35 = vld [vmem:[%s5330_s6 + $0x80] sm:$0xff] }
  0x6d   : > { %2546 = vst [vmem:[%s3817_s19 + $0x348] sm:$0xff] %v2002_v37  ;;  %v3454_v37 = vor.u32 %v3685_v34, %v3453_v33  ;;  %v2067_v17 = vperm.slane %v4141_v35, 6 }
  0x6e   : > { %2547 = vst [vmem:[%s3817_s19 + $0x350] sm:$0xff] %v2003_v38  ;;  %v3677_v38 = vld [vmem:[%s5327_s3 + $0x384] sm:$0xf] }
  0x6f   : > { %2548 = vst [vmem:[%s3817_s19 + $0x358] sm:$0xff] %v2004_v39  ;;  %v3455_v39 = vld [vmem:[%s5327_s3 + $0x3c0] sm:$0xf0]  ;;  %1575 = vmatpush.bf16.msrb.mxu2 %v3454_v37  ;;  %v4279_v37 = vld [vmem:[%s5330_s6 + $0x90] sm:$0xff] }
  0x70   : > { %2549 = vst [vmem:[%s3817_s19 + $0x360] sm:$0xff] %v2005_v40  ;;  %v2057_v40 = vperm.slane %v4121_v26, 4 }
  0x71   : > { %2550 = vst [vmem:[%s3817_s19 + $0x368] sm:$0xff] %v2006_v41  ;;  %v3458_v41 = vor.u32 %v3677_v38, %v3455_v39 }
  0x72   : > { %2551 = vst [vmem:[%s3817_s19 + $0x370] sm:$0xff] %v2007_v42  ;;  %v3461_v42 = vld [vmem:[%s5327_s3 + $0x388] sm:$0xf] }
  0x73   : > { %2552 = vst [vmem:[%s3817_s19 + $0x378] sm:$0xff] %v2008_v43  ;;  %v3686_v43 = vld [vmem:[%s5327_s3 + $0x3c4] sm:$0xf0]  ;;  %1588 = vmatpush.bf16.msrb.mxu3 %v3458_v41  ;;  %v3199_v41 = vld [vmem:[%s5327_s3 + $0x1c0] sm:$0xf0] }
  0x74   : > { %2553 = vst [vmem:[%s3817_s19 + $0x380] sm:$0xff] %v2009_v44  ;;  %v2058_v44 = vperm.slane %v4121_v26, 5  ;;  %v3462_v45 = vor.u32 %v3686_v43, %v3461_v42 }
  0x75   : > { %2554 = vst [vmem:[%s3817_s19 + $0x388] sm:$0xff] %v2010_v46  ;;  %v3678_v46 = vld [vmem:[%s5327_s3 + $0x38c] sm:$0xf] }
  0x76   : > { %2555 = vst [vmem:[%s3817_s19 + $0x390] sm:$0xff] %v2011_v47  ;;  %v3463_v47 = vld [vmem:[%s5327_s3 + $0x3c8] sm:$0xf0]  ;;  %1601 = vmatpush.bf16.msra.mxu0 %v3462_v45  ;;  %v3622_v45 = vld [vmem:[%s5327_s3 + $0x1c4] sm:$0xf0] }
  0x77   : > { %2556 = vst [vmem:[%s3817_s19 + $0x398] sm:$0xff] %v2012_v48  ;;  %v2059_v48 = vperm.slane %v4121_v26, 6 }
  0x78   : > { %2557 = vst [vmem:[%s3817_s19 + $0x3a0] sm:$0xff] %v2013_v49  ;;  %v3466_v49 = vor.u32 %v3678_v46, %v3463_v47 }
  0x79   : > { %2558 = vst [vmem:[%s3817_s19 + $0x3a8] sm:$0xff] %v2014_v50  ;;  %v3389_v50 = vld [vmem:[%s5327_s3 + $0x300] sm:$0xf] }
  0x7a   : > { %2559 = vst [vmem:[%s3817_s19 + $0x3b0] sm:$0xff] %v2015_v51  ;;  %v3669_v51 = vld [vmem:[%s5327_s3 + $0x33c] sm:$0xf0]  ;;  %1614 = vmatpush.bf16.msra.mxu1 %v3466_v49  ;;  %v3207_v49 = vld [vmem:[%s5327_s3 + $0x1c8] sm:$0xf0] }
  0x7b   : > { %2560 = vst [vmem:[%s3817_s19 + $0x3b8] sm:$0xff] %v2016_v52  ;;  %v2060_v52 = vperm.slane %v4121_v26, 7 }
  0x7c   : > { %2561 = vst [vmem:[%s3817_s19 + $0x3c0] sm:$0xff] %v2017_v53  ;;  %v3390_v53 = vor.u32 %v3669_v51, %v3389_v50 }
  0x7d   : > { %2562 = vst [vmem:[%s3817_s19 + $0x3c8] sm:$0xff] %v2018_v55  ;;  %v3391_v55 = vld [vmem:[%s5327_s3 + $0x340] sm:$0xf0] }
  0x7e   : > { %2563 = vst [vmem:[%s3817_s19 + $0x3d0] sm:$0xff] %v2019_v56  ;;  %v2061_v56 = vperm.slane %v4141_v35, 0  ;;  %1576 = vmatpush.bf16.msrb.mxu2 %v3390_v53  ;;  %v3605_v53 = vld [vmem:[%s5327_s3 + $0x13c] sm:$0xf0] }
  0x7f   : > { %2564 = vst [vmem:[%s3817_s19 + $0x3d8] sm:$0xff] %v2020_v57  ;;  %v3394_v57 = vor.u32 %v3661_v54, %v3391_v55 }
  0x80   : > { %2565 = vst [vmem:[%s3817_s19 + $0x3e0] sm:$0xff] %v2021_v58  ;;  %v3397_v58 = vld [vmem:[%s5327_s3 + $0x308] sm:$0xf] }
  0x81   : > { %2566 = vst [vmem:[%s3817_s19 + $0x3e8] sm:$0xff] %v2022_v59  ;;  %v3670_v59 = vld [vmem:[%s5327_s3 + $0x344] sm:$0xf0]  ;;  %1589 = vmatpush.bf16.msrb.mxu3 %v3394_v57  ;;  %v3135_v57 = vld [vmem:[%s5327_s3 + $0x140] sm:$0xf0] }
  0x82   : > { %2567 = vst [vmem:[%s3817_s19 + $0x3f0] sm:$0xff] %v2023_v60  ;;  %v2062_v60 = vperm.slane %v4141_v35, 1 }
  0x83   : > { %2568 = vst [vmem:[%s3817_s19 + $0x3f8] sm:$0xff] %v2024_v61  ;;  %v3398_v61 = vor.u32 %v3670_v59, %v3397_v58  ;;  %v2077_v58 = vperm.slane %v4279_v37, 0 }
  0x84   : > { %2569 = vst [vmem:[%s3817_s19 + $0x400] sm:$0xff] %v2025_v62  ;;  %v3662_v62 = vld [vmem:[%s5327_s3 + $0x30c] sm:$0xf] }
  0x85   : > { %2570 = vst [vmem:[%s3817_s19 + $0x408] sm:$0xff] %v2026_v0  ;;  %v2063_v0 = vperm.slane %v4141_v35, 2  ;;  %1602 = vmatpush.bf16.msra.mxu0 %v3398_v61  ;;  %v3606_v61 = vld [vmem:[%s5327_s3 + $0x144] sm:$0xf0] }
  0x86   : > { %2571 = vst [vmem:[%s3817_s19 + $0x410] sm:$0xff] %v2027_v1  ;;  %v3402_v1 = vor.u32 %v3662_v62, %v3399_v63  ;;  %v2078_v62 = vperm.slane %v4279_v37, 1 }
  0x87   : > { %2572 = vst [vmem:[%s3817_s19 + $0x418] sm:$0xff] %v2028_v2  ;;  %v3325_v2 = vld [vmem:[%s5327_s3 + $0x280] sm:$0xf] }
  0x88   : > { %2573 = vst [vmem:[%s3817_s19 + $0x420] sm:$0xff] %v2029_v3  ;;  %v3653_v3 = vld [vmem:[%s5327_s3 + $0x2bc] sm:$0xf0]  ;;  %1615 = vmatpush.bf16.msra.mxu1 %v3402_v1  ;;  %v3143_v1 = vld [vmem:[%s5327_s3 + $0x148] sm:$0xf0] }
  0x89   : > { %2574 = vst [vmem:[%s3817_s19 + $0x428] sm:$0xff] %v2030_v4  ;;  %v4210_v4 = vld [vmem:[%s5330_s6 + $0x88] sm:$0xff] }
  0x8a   : > { %2575 = vst [vmem:[%s3817_s19 + $0x430] sm:$0xff] %v2031_v5  ;;  %v2064_v5 = vperm.slane %v4141_v35, 3  ;;  %v2071_v33 = vperm.slane %v4210_v4, 2  ;;  %v2072_v38 = vperm.slane %v4210_v4, 3  ;;  %v2073_v42 = vperm.slane %v4210_v4, 4 }
  0x8b   : > { %2576 = vst [vmem:[%s3817_s19 + $0x438] sm:$0xff] %v2032_v6  ;;  %v3326_v6 = vor.u32 %v3653_v3, %v3325_v2  ;;  %v2074_v46 = vperm.slane %v4210_v4, 5  ;;  %v2075_v50 = vperm.slane %v4210_v4, 6  ;;  %v2076_v54 = vperm.slane %v4210_v4, 7 }
  0x8c   : > { %2577 = vst [vmem:[%s3817_s19 + $0x440] sm:$0xff] %v2033_v7  ;;  %v3645_v7 = vld [vmem:[%s5327_s3 + $0x284] sm:$0xf]  ;;  %v2079_v2 = vperm.slane %v4279_v37, 2 }
  0x8d   : > { %2578 = vst [vmem:[%s3817_s19 + $0x448] sm:$0xff] %v2034_v9  ;;  %v2065_v9 = vperm.slane %v4141_v35, 4  ;;  %1577 = vmatpush.bf16.msrb.mxu2 %v3326_v6  ;;  %v4348_v6 = vld [vmem:[%s5330_s6 + $0x98] sm:$0xff] }
  0x8e   : > { %2579 = vst [vmem:[%s3817_s19 + $0x450] sm:$0xff] %v2035_v10  ;;  %v3330_v10 = vor.u32 %v3645_v7, %v3327_v8  ;;  %v2080_v7 = vperm.slane %v4279_v37, 3 }
  0x8f   : > { %2580 = vst [vmem:[%s3817_s19 + $0x458] sm:$0xff] %v2036_v11  ;;  %v3333_v11 = vld [vmem:[%s5327_s3 + $0x288] sm:$0xf] }
  0x90   : > { %2581 = vst [vmem:[%s3817_s19 + $0x460] sm:$0xff] %v2037_v12  ;;  %v3654_v12 = vld [vmem:[%s5327_s3 + $0x2c4] sm:$0xf0]  ;;  %1590 = vmatpush.bf16.msrb.mxu3 %v3330_v10  ;;  %v3071_v10 = vld [vmem:[%s5327_s3 + $0xc0] sm:$0xf0] }
  0x91   : > { %2582 = vst [vmem:[%s3817_s19 + $0x468] sm:$0xff] %v2038_v13  ;;  %v2066_v13 = vperm.slane %v4141_v35, 5 }
  0x92   : > { %2583 = vst [vmem:[%s3817_s19 + $0x470] sm:$0xff] %v2039_v14  ;;  %v3334_v14 = vor.u32 %v3654_v12, %v3333_v11  ;;  %v2081_v11 = vperm.slane %v4279_v37, 4 }
  0x93   : > { %2584 = vst [vmem:[%s3817_s19 + $0x478] sm:$0xff] %v2040_v15  ;;  %v3646_v15 = vld [vmem:[%s5327_s3 + $0x28c] sm:$0xf] }
  0x94   : > { %2585 = vst [vmem:[%s3817_s19 + $0x480] sm:$0xff] %v2041_v16  ;;  %v3335_v16 = vld [vmem:[%s5327_s3 + $0x2c8] sm:$0xf0]  ;;  %1603 = vmatpush.bf16.msra.mxu0 %v3334_v14  ;;  %v3590_v14 = vld [vmem:[%s5327_s3 + $0xc4] sm:$0xf0] }
  0x95   : > { %2586 = vst [vmem:[%s3817_s19 + $0x488] sm:$0xff] %v2042_v18  ;;  %v3338_v18 = vor.u32 %v3646_v15, %v3335_v16  ;;  %v2082_v15 = vperm.slane %v4279_v37, 5 }
  0x96   : > { %2587 = vst [vmem:[%s3817_s19 + $0x490] sm:$0xff] %v2043_v19  ;;  %v3261_v19 = vld [vmem:[%s5327_s3 + $0x200] sm:$0xf] }
  0x97   : > { %2588 = vst [vmem:[%s3817_s19 + $0x498] sm:$0xff] %v2044_v20  ;;  %v3637_v20 = vld [vmem:[%s5327_s3 + $0x23c] sm:$0xf0]  ;;  %1616 = vmatpush.bf16.msra.mxu1 %v3338_v18  ;;  %v3079_v18 = vld [vmem:[%s5327_s3 + $0xc8] sm:$0xf0] }
  0x98   : > { %2589 = vst [vmem:[%s3817_s19 + $0x4a0] sm:$0xff] %v2045_v21  ;;  %v2068_v21 = vperm.slane %v4141_v35, 7  ;;  %v3197_v35 = vld [vmem:[%s5327_s3 + $0x180] sm:$0xf] }
  0x99   : > { %2590 = vst [vmem:[%s3817_s19 + $0x4a8] sm:$0xff] %v2046_v22  ;;  %v3262_v22 = vor.u32 %v3637_v20, %v3261_v19  ;;  %v2083_v19 = vperm.slane %v4279_v37, 6 }
  0x9a   : > { %2591 = vst [vmem:[%s3817_s19 + $0x4b0] sm:$0xff] %v2047_v23  ;;  %v3629_v23 = vld [vmem:[%s5327_s3 + $0x204] sm:$0xf] }
  0x9b   : > { %2592 = vst [vmem:[%s3817_s19 + $0x4b8] sm:$0xff] %v2048_v24  ;;  %v3263_v24 = vld [vmem:[%s5327_s3 + $0x240] sm:$0xf0]  ;;  %1578 = vmatpush.bf16.msrb.mxu2 %v3262_v22  ;;  %v3005_v22 = vld [vmem:[%s5327_s3] sm:$0xf] }
  0x9c   : > { %2593 = vst [vmem:[%s3817_s19 + $0x4c0] sm:$0xff] %v2049_v25  ;;  %v2069_v25 = vperm.slane %v4210_v4, 0  ;;  %v3266_v26 = vor.u32 %v3629_v23, %v3263_v24  ;;  %v3573_v23 = vld [vmem:[%s5327_s3 + $0x3c] sm:$0xf0]  ;;  %v2084_v24 = vperm.slane %v4279_v37, 7  ;;  %v2087_v37 = vperm.slane %v4348_v6, 2 }
  0x9d   : > { %2594 = vst [vmem:[%s3817_s19 + $0x4c8] sm:$0xff] %v2050_v27  ;;  %v3269_v27 = vld [vmem:[%s5327_s3 + $0x208] sm:$0xf] }
  0x9e   : > { %2595 = vst [vmem:[%s3817_s19 + $0x4d0] sm:$0xff] %v2051_v28  ;;  %v3638_v28 = vld [vmem:[%s5327_s3 + $0x244] sm:$0xf0]  ;;  %1591 = vmatpush.bf16.msrb.mxu3 %v3266_v26  ;;  %v3565_v26 = vld [vmem:[%s5327_s3 + $0x4] sm:$0xf] }
  0x9f   : > { %2596 = vst [vmem:[%s3817_s19 + $0x4d8] sm:$0xff] %v2052_v29  ;;  %v2070_v29 = vperm.slane %v4210_v4, 1  ;;  %v3069_v4 = vld [vmem:[%s5327_s3 + $0x80] sm:$0xf] }
  0xa0   : > { %2597 = vst [vmem:[%s3817_s19 + $0x4e0] sm:$0xff] %v2053_v30  ;;  %v3270_v30 = vor.u32 %v3638_v28, %v3269_v27  ;;  %v3007_v27 = vld [vmem:[%s5327_s3 + $0x40] sm:$0xf0]  ;;  %v2085_v28 = vperm.slane %v4348_v6, 0 }
  0xa1   : > { %2598 = vst [vmem:[%s3817_s19 + $0x4e8] sm:$0xff] %v2054_v31  ;;  %v3630_v31 = vld [vmem:[%s5327_s3 + $0x20c] sm:$0xf] }
  0xa2   : > { %2599 = vst [vmem:[%s3817_s19 + $0x4f0] sm:$0xff] %v2055_v32  ;;  %v3271_v32 = vld [vmem:[%s5327_s3 + $0x248] sm:$0xf0]  ;;  %1604 = vmatpush.bf16.msra.mxu0 %v3270_v30  ;;  %v3010_v30 = vor.u32 %v3565_v26, %v3007_v27  ;;  %v3351_v26 = vld [vmem:[%s5327_s3 + $0x2d8] sm:$0xf0] }
  0xa3   : > { %2600 = vst [vmem:[%s3817_s19 + $0x4f8] sm:$0xff] %v2056_v36  ;;  %v3274_v34 = vor.u32 %v3630_v31, %v3271_v32  ;;  %v3621_v36 = vld [vmem:[%s5327_s3 + $0x1bc] sm:$0xf0]  ;;  %v3013_v31 = vld [vmem:[%s5327_s3 + $0x8] sm:$0xf] }
  0xa4   : > { %2601 = vst [vmem:[%s3817_s19 + $0x500] sm:$0xff] %v2057_v40  ;;  %v3198_v39 = vor.u32 %v3621_v36, %v3197_v35  ;;  %v3613_v40 = vld [vmem:[%s5327_s3 + $0x184] sm:$0xf]  ;;  %v3574_v32 = vld [vmem:[%s5327_s3 + $0x44] sm:$0xf0] }
  0xa5   : > { %2602 = vst [vmem:[%s3817_s19 + $0x508] sm:$0xff] %v2058_v44  ;;  %1617 = vmatpush.bf16.msra.mxu1 %v3274_v34  ;;  %v3202_v43 = vor.u32 %v3613_v40, %v3199_v41  ;;  %v3205_v44 = vld [vmem:[%s5327_s3 + $0x188] sm:$0xf]  ;;  %v3014_v34 = vor.u32 %v3574_v32, %v3013_v31  ;;  %v3566_v35 = vld [vmem:[%s5327_s3 + $0xc] sm:$0xf]  ;;  %v2088_v41 = vperm.slane %v4348_v6, 3 }
  0xa6   : > { %2603 = vst [vmem:[%s3817_s19 + $0x510] sm:$0xff] %v2059_v48  ;;  %1579 = vmatpush.bf16.msrb.mxu2 %v3198_v39  ;;  %v3206_v47 = vor.u32 %v3622_v45, %v3205_v44  ;;  %v3614_v48 = vld [vmem:[%s5327_s3 + $0x18c] sm:$0xf]  ;;  %v3469_v39 = vld [vmem:[%s5327_s3 + $0x390] sm:$0xf]  ;;  %v2089_v45 = vperm.slane %v4348_v6, 4 }
  0xa7   : > { %2604 = vst [vmem:[%s3817_s19 + $0x518] sm:$0xff] %v2060_v52  ;;  %1592 = vmatpush.bf16.msrb.mxu3 %v3202_v43  ;;  %v3210_v51 = vor.u32 %v3614_v48, %v3207_v49  ;;  %v3133_v52 = vld [vmem:[%s5327_s3 + $0x100] sm:$0xf]  ;;  %v3015_v36 = vld [vmem:[%s5327_s3 + $0x48] sm:$0xf0] }
  0xa8   : > { %2605 = vst [vmem:[%s3817_s19 + $0x520] sm:$0xff] %v2061_v56  ;;  %1605 = vmatpush.bf16.msra.mxu0 %v3206_v47  ;;  %v3134_v55 = vor.u32 %v3605_v53, %v3133_v52  ;;  %v3597_v56 = vld [vmem:[%s5327_s3 + $0x104] sm:$0xf]  ;;  %v3687_v40 = vld [vmem:[%s5327_s3 + $0x3cc] sm:$0xf0]  ;;  %v2091_v53 = vperm.slane %v4348_v6, 6 }
  0xa9   : > { %2606 = vst [vmem:[%s3817_s19 + $0x528] sm:$0xff] %v2062_v60  ;;  %1618 = vmatpush.bf16.msra.mxu1 %v3210_v51  ;;  %v3138_v59 = vor.u32 %v3597_v56, %v3135_v57  ;;  %v3141_v60 = vld [vmem:[%s5327_s3 + $0x108] sm:$0xf]  ;;  %v3679_v43 = vld [vmem:[%s5327_s3 + $0x394] sm:$0xf]  ;;  %v4437_v49 = vld [vmem:[%s5330_s6 + $0xa0] sm:$0xff] }
  0xaa   : > { %2607 = vst [vmem:[%s3817_s19 + $0x530] sm:$0xff] %v2063_v0  ;;  %1580 = vmatpush.bf16.msrb.mxu2 %v3134_v55  ;;  %v3142_v63 = vor.u32 %v3606_v61, %v3141_v60  ;;  %v3598_v0 = vld [vmem:[%s5327_s3 + $0x10c] sm:$0xf]  ;;  %v3471_v44 = vld [vmem:[%s5327_s3 + $0x3d0] sm:$0xf0]  ;;  %v2092_v57 = vperm.slane %v4348_v6, 7 }
  0xab   : > { %2608 = vst [vmem:[%s3817_s19 + $0x538] sm:$0xff] %v2064_v5  ;;  %1593 = vmatpush.bf16.msrb.mxu3 %v3138_v59  ;;  %v3146_v3 = vor.u32 %v3598_v0, %v3143_v1  ;;  %v3589_v5 = vld [vmem:[%s5327_s3 + $0xbc] sm:$0xf0]  ;;  %v3477_v47 = vld [vmem:[%s5327_s3 + $0x398] sm:$0xf]  ;;  %v2093_v61 = vperm.slane %v4437_v49, 0 }
  0xac   : > { %2609 = vst [vmem:[%s3817_s19 + $0x540] sm:$0xff] %v2065_v9  ;;  %1606 = vmatpush.bf16.msra.mxu0 %v3142_v63  ;;  %v3070_v8 = vor.u32 %v3589_v5, %v3069_v4  ;;  %v3581_v9 = vld [vmem:[%s5327_s3 + $0x84] sm:$0xf]  ;;  %v3688_v48 = vld [vmem:[%s5327_s3 + $0x3d4] sm:$0xf0] }
  0xad   : > { %2610 = vst [vmem:[%s3817_s19 + $0x548] sm:$0xff] %v2066_v13  ;;  %1619 = vmatpush.bf16.msra.mxu1 %v3146_v3  ;;  %v3074_v12 = vor.u32 %v3581_v9, %v3071_v10  ;;  %v3077_v13 = vld [vmem:[%s5327_s3 + $0x88] sm:$0xf]  ;;  %v3478_v51 = vor.u32 %v3688_v48, %v3477_v47  ;;  %v3680_v52 = vld [vmem:[%s5327_s3 + $0x39c] sm:$0xf] }
  0xae   : > { %2611 = vst [vmem:[%s3817_s19 + $0x550] sm:$0xff] %v2067_v17  ;;  %1581 = vmatpush.bf16.msrb.mxu2 %v3070_v8  ;;  %v3078_v16 = vor.u32 %v3590_v14, %v3077_v13  ;;  %v3582_v17 = vld [vmem:[%s5327_s3 + $0x8c] sm:$0xf]  ;;  %v3405_v56 = vld [vmem:[%s5327_s3 + $0x310] sm:$0xf] }
  0xaf   : > { %2612 = vst [vmem:[%s3817_s19 + $0x558] sm:$0xff] %v2068_v21  ;;  %1594 = vmatpush.bf16.msrb.mxu3 %v3074_v12  ;;  %v3082_v20 = vor.u32 %v3582_v17, %v3079_v18  ;;  %v4376_v21 = vpop.f32.mrf.mxu0  ;;  %v3671_v59 = vld [vmem:[%s5327_s3 + $0x34c] sm:$0xf0]  ;;  %v3663_v60 = vld [vmem:[%s5327_s3 + $0x314] sm:$0xf]  ;;  %v4487_v10 = vld [vmem:[%s5330_s6 + $0xa8] sm:$0xff] }
  0xb0   : > { %2613 = vst [vmem:[%s3817_s19 + $0x560] sm:$0xff] %v2069_v25  ;;  %1607 = vmatpush.bf16.msra.mxu0 %v3078_v16  ;;  %v3006_v25 = vor.u32 %v3573_v23, %v3005_v22  ;;  %v3407_v63 = vld [vmem:[%s5327_s3 + $0x350] sm:$0xf0]  ;;  %v3413_v0 = vld [vmem:[%s5327_s3 + $0x318] sm:$0xf] }
  0xb1   : > { %2614 = vst [vmem:[%s3817_s19 + $0x568] sm:$0xff] %v2070_v29  ;;  %1620 = vmatpush.bf16.msra.mxu1 %v3082_v20  ;;  %v4394_v29 = vpop.f32.mrf.mxu1  ;;  %v3410_v3 = vor.u32 %v3663_v60, %v3407_v63  ;;  %v3672_v4 = vld [vmem:[%s5327_s3 + $0x354] sm:$0xf0]  ;;  %v3664_v5 = vld [vmem:[%s5327_s3 + $0x31c] sm:$0xf] }
  0xb2   : > { %2615 = vst [vmem:[%s3817_s19 + $0x570] sm:$0xff] %v2071_v33  ;;  %v2086_v33 = vperm.slane %v4348_v6, 1  ;;  %1582 = vmatpush.bf16.msrb.mxu2 %v3006_v25  ;;  %v3415_v8 = vld [vmem:[%s5327_s3 + $0x358] sm:$0xf0]  ;;  %v3341_v9 = vld [vmem:[%s5327_s3 + $0x290] sm:$0xf] }
  0xb3   : > { %2616 = vst [vmem:[%s3817_s19 + $0x578] sm:$0xff] %v2072_v38  ;;  %1595 = vmatpush.bf16.msrb.mxu3 %v3010_v30  ;;  %v3018_v38 = vor.u32 %v3566_v35, %v3015_v36  ;;  %v3418_v12 = vor.u32 %v3664_v5, %v3415_v8  ;;  %v3655_v13 = vld [vmem:[%s5327_s3 + $0x2cc] sm:$0xf0]  ;;  %v3647_v14 = vld [vmem:[%s5327_s3 + $0x294] sm:$0xf] }
  0xb4   : > { %2617 = vst [vmem:[%s3817_s19 + $0x580] sm:$0xff] %v2073_v42  ;;  %1608 = vmatpush.bf16.msra.mxu0 %v3014_v34  ;;  %v3470_v42 = vor.u32 %v3687_v40, %v3469_v39  ;;  %v3342_v16 = vor.u32 %v3655_v13, %v3341_v9  ;;  %v3343_v17 = vld [vmem:[%s5327_s3 + $0x2d0] sm:$0xf0]  ;;  %v3349_v18 = vld [vmem:[%s5327_s3 + $0x298] sm:$0xf] }
  0xb5   : > { %2618 = vst [vmem:[%s3817_s19 + $0x588] sm:$0xff] %v2074_v46  ;;  %1621 = vmatpush.bf16.msra.mxu1 %v3018_v38  ;;  %v3474_v46 = vor.u32 %v3679_v43, %v3471_v44  ;;  %v3346_v20 = vor.u32 %v3647_v14, %v3343_v17  ;;  %v3656_v22 = vld [vmem:[%s5327_s3 + $0x2d4] sm:$0xf0]  ;;  %v3648_v23 = vld [vmem:[%s5327_s3 + $0x29c] sm:$0xf] }
  0xb6   : > { %2619 = vst [vmem:[%s3817_s19 + $0x590] sm:$0xff] %v2075_v50  ;;  %v2090_v50 = vperm.slane %v4348_v6, 5  ;;  %1627 = vmatpush.bf16.msra.mxu2 %v3470_v42  ;;  %v2095_v6 = vperm.slane %v4437_v49, 2  ;;  %v3350_v25 = vor.u32 %v3656_v22, %v3349_v18  ;;  %v3277_v27 = vld [vmem:[%s5327_s3 + $0x210] sm:$0xf]  ;;  %v3354_v30 = vor.u32 %v3648_v23, %v3351_v26  ;;  %v4625_v14 = vld [vmem:[%s5330_s6 + $0xb8] sm:$0xff] }
  0xb7   : > { %2620 = vst [vmem:[%s3817_s19 + $0x598] sm:$0xff] %v2076_v54  ;;  %1640 = vmatpush.bf16.msra.mxu3 %v3474_v46  ;;  %v3479_v54 = vld [vmem:[%s5327_s3 + $0x3d8] sm:$0xf0]  ;;  %v702_v55 = vpop.f32.mrf.mxu0  ;;  %v3639_v31 = vld [vmem:[%s5327_s3 + $0x24c] sm:$0xf0]  ;;  %v2104_v46 = vperm.slane %v4487_v10, 3 }
  0xb8   : > { %2621 = vst [vmem:[%s3817_s19 + $0x5a0] sm:$0xff] %v2077_v58  ;;  %1653 = vmatpush.bf16.msrb.mxu0 %v3478_v51  ;;  %v3482_v58 = vor.u32 %v3680_v52, %v3479_v54  ;;  %v3631_v32 = vld [vmem:[%s5327_s3 + $0x214] sm:$0xf]  ;;  %v3278_v34 = vor.u32 %v3639_v31, %v3277_v27  ;;  %v3285_v36 = vld [vmem:[%s5327_s3 + $0x218] sm:$0xf]  ;;  %v2106_v54 = vperm.slane %v4487_v10, 5 }
  0xb9   : > { %2622 = vst [vmem:[%s3817_s19 + $0x5a8] sm:$0xff] %v2078_v62  ;;  %v3406_v62 = vor.u32 %v3671_v59, %v3405_v56  ;;  %v715_v1 = vpop.f32.mrf.mxu1  ;;  %v3279_v35 = vld [vmem:[%s5327_s3 + $0x250] sm:$0xf0]  ;;  %v3640_v39 = vld [vmem:[%s5327_s3 + $0x254] sm:$0xf0] }
  0xba   : > { %2623 = vst [vmem:[%s3817_s19 + $0x5b0] sm:$0xff] %v2079_v2  ;;  %v2094_v2 = vperm.slane %v4437_v49, 1  ;;  %1666 = vmatpush.bf16.msrb.mxu1 %v3482_v58  ;;  %v3282_v38 = vor.u32 %v3631_v32, %v3279_v35  ;;  %v3632_v40 = vld [vmem:[%s5327_s3 + $0x21c] sm:$0xf]  ;;  %v3286_v42 = vor.u32 %v3640_v39, %v3285_v36  ;;  %v3213_v44 = vld [vmem:[%s5327_s3 + $0x190] sm:$0xf] }
  0xbb   : > { %2624 = vst [vmem:[%s3817_s19 + $0x5b8] sm:$0xff] %v2080_v7  ;;  %1628 = vmatpush.bf16.msra.mxu2 %v3406_v62  ;;  %v3414_v7 = vor.u32 %v3672_v4, %v3413_v0  ;;  %1641 = vmatpush.bf16.msra.mxu3 %v3410_v3  ;;  %v3287_v43 = vld [vmem:[%s5327_s3 + $0x258] sm:$0xf0]  ;;  %v3623_v48 = vld [vmem:[%s5327_s3 + $0x1cc] sm:$0xf0]  ;;  %v2107_v58 = vperm.slane %v4487_v10, 6 }
  0xbc   : > { %2625 = vst [vmem:[%s3817_s19 + $0x5c0] sm:$0xff] %v2081_v11  ;;  %v2096_v11 = vperm.slane %v4437_v49, 3  ;;  %v3290_v47 = vor.u32 %v3632_v40, %v3287_v43  ;;  %v3214_v51 = vor.u32 %v3623_v48, %v3213_v44  ;;  %v3215_v52 = vld [vmem:[%s5327_s3 + $0x1d0] sm:$0xf0]  ;;  %v3624_v56 = vld [vmem:[%s5327_s3 + $0x1d4] sm:$0xf0] }
  0xbd   : > { %2626 = vst [vmem:[%s3817_s19 + $0x5c8] sm:$0xff] %v2082_v15  ;;  %v2097_v15 = vperm.slane %v4437_v49, 4  ;;  %1654 = vmatpush.bf16.msrb.mxu0 %v3414_v7  ;;  %v3223_v60 = vld [vmem:[%s5327_s3 + $0x1d8] sm:$0xf0]  ;;  %v2108_v62 = vperm.slane %v4487_v10, 7 }
  0xbe   : > { %2627 = vst [vmem:[%s3817_s19 + $0x5d0] sm:$0xff] %v2083_v19  ;;  %v2098_v19 = vperm.slane %v4437_v49, 5  ;;  %1667 = vmatpush.bf16.msrb.mxu1 %v3418_v12  ;;  %v3607_v0 = vld [vmem:[%s5327_s3 + $0x14c] sm:$0xf0]  ;;  %v3599_v1 = vld [vmem:[%s5327_s3 + $0x114] sm:$0xf] }
  0xbf   : > { %2628 = vst [vmem:[%s3817_s19 + $0x5d8] sm:$0xff] %v2084_v24  ;;  %v2099_v24 = vperm.slane %v4437_v49, 6  ;;  %1629 = vmatpush.bf16.msra.mxu2 %v3342_v16  ;;  %1642 = vmatpush.bf16.msra.mxu3 %v3346_v20  ;;  %v3151_v4 = vld [vmem:[%s5327_s3 + $0x150] sm:$0xf0]  ;;  %v3157_v5 = vld [vmem:[%s5327_s3 + $0x118] sm:$0xf] }
  0xc0   : > { %2629 = vst [vmem:[%s3817_s19 + $0x5e0] sm:$0xff] %v2085_v28  ;;  %v2100_v28 = vperm.slane %v4437_v49, 7  ;;  %v3615_v49 = vld [vmem:[%s5327_s3 + $0x194] sm:$0xf]  ;;  %v3154_v7 = vor.u32 %v3599_v1, %v3151_v4  ;;  %v3608_v8 = vld [vmem:[%s5327_s3 + $0x154] sm:$0xf0] }
  0xc1   : > { %2630 = vst [vmem:[%s3817_s19 + $0x5e8] sm:$0xff] %v2086_v33  ;;  %v2101_v33 = vperm.slane %v4487_v10, 0  ;;  %1655 = vmatpush.bf16.msrb.mxu0 %v3350_v25  ;;  %v3218_v55 = vor.u32 %v3615_v49, %v3215_v52  ;;  %v3600_v9 = vld [vmem:[%s5327_s3 + $0x11c] sm:$0xf]  ;;  %v3085_v13 = vld [vmem:[%s5327_s3 + $0x90] sm:$0xf]  ;;  %v739_v1 = vpop.f32.mrf.mxu3 }
  0xc2   : > { %2631 = vst [vmem:[%s3817_s19 + $0x5f0] sm:$0xff] %v2087_v37  ;;  %v2102_v37 = vperm.slane %v4487_v10, 1  ;;  %1668 = vmatpush.bf16.msrb.mxu1 %v3354_v30  ;;  %v3159_v12 = vld [vmem:[%s5327_s3 + $0x158] sm:$0xf0]  ;;  %v3591_v17 = vld [vmem:[%s5327_s3 + $0xcc] sm:$0xf0] }
  0xc3   : > { %2632 = vst [vmem:[%s3817_s19 + $0x5f8] sm:$0xff] %v2088_v41  ;;  %v2103_v41 = vperm.slane %v4487_v10, 2  ;;  %1630 = vmatpush.bf16.msra.mxu2 %v3278_v34  ;;  %1643 = vmatpush.bf16.msra.mxu3 %v3282_v38  ;;  %v3162_v16 = vor.u32 %v3600_v9, %v3159_v12  ;;  %v3583_v18 = vld [vmem:[%s5327_s3 + $0x94] sm:$0xf]  ;;  %v3086_v20 = vor.u32 %v3591_v17, %v3085_v13  ;;  %v3093_v23 = vld [vmem:[%s5327_s3 + $0x98] sm:$0xf] }
  0xc4   : > { %2633 = vst [vmem:[%s3817_s19 + $0x600] sm:$0xff] %v2089_v45  ;;  %v4556_v45 = vld [vmem:[%s5330_s6 + $0xb0] sm:$0xff]  ;;  %v3703_v25 = vld [vmem:[%s5326_s2] ss:$0 sm:$0xff]  ;;  %v3592_v27 = vld [vmem:[%s5327_s3 + $0xd4] sm:$0xf0] }
  0xc5   : > { %2634 = vst [vmem:[%s3817_s19 + $0x608] sm:$0xff] %v2090_v50  ;;  %v2105_v50 = vperm.slane %v4487_v10, 4  ;;  %1656 = vmatpush.bf16.msrb.mxu0 %v3286_v42  ;;  %v2111_v10 = vperm.slane %v4556_v45, 2  ;;  %v3087_v22 = vld [vmem:[%s5327_s3 + $0xd0] sm:$0xf0]  ;;  %v2115_v30 = vperm.slane %v4556_v45, 6  ;;  %v3094_v31 = vor.u32 %v3592_v27, %v3093_v23 }
  0xc6   : > { %2635 = vst [vmem:[%s3817_s19 + $0x610] sm:$0xff] %v2091_v53  ;;  %v3221_v53 = vld [vmem:[%s5327_s3 + $0x198] sm:$0xf]  ;;  %1669 = vmatpush.bf16.msrb.mxu1 %v3290_v47  ;;  %v3090_v26 = vor.u32 %v3583_v18, %v3087_v22  ;;  %v3095_v32 = vld [vmem:[%s5327_s3 + $0xd8] sm:$0xf0]  ;;  %v2116_v34 = vperm.slane %v4556_v45, 7 }
  0xc7   : > { %2636 = vst [vmem:[%s3817_s19 + $0x618] sm:$0xff] %v2092_v57  ;;  %v3616_v57 = vld [vmem:[%s5327_s3 + $0x19c] sm:$0xf]  ;;  %1631 = vmatpush.bf16.msra.mxu2 %v3214_v51  ;;  %v3222_v59 = vor.u32 %v3624_v56, %v3221_v53  ;;  %1644 = vmatpush.bf16.msra.mxu3 %v3218_v55  ;;  %v3575_v36 = vld [vmem:[%s5327_s3 + $0x4c] sm:$0xf0]  ;;  %v2117_v38 = vperm.slane %v4625_v14, 0 }
  0xc8   : > { %2637 = vst [vmem:[%s3817_s19 + $0x620] sm:$0xff] %v2093_v61  ;;  %v3149_v61 = vld [vmem:[%s5327_s3 + $0x110] sm:$0xf]  ;;  %v3226_v63 = vor.u32 %v3616_v57, %v3223_v60  ;;  %v3023_v40 = vld [vmem:[%s5327_s3 + $0x50] sm:$0xf0]  ;;  %v2118_v42 = vperm.slane %v4625_v14, 1  ;;  %v752_v55 = vpop.f32.mrf.mxu0 }
  0xc9   : > { %2638 = vst [vmem:[%s3817_s19 + $0x628] sm:$0xff] %v2094_v2  ;;  %v2109_v2 = vperm.slane %v4556_v45, 0  ;;  %1657 = vmatpush.bf16.msrb.mxu0 %v3222_v59  ;;  %v3150_v3 = vor.u32 %v3607_v0, %v3149_v61  ;;  %v3576_v44 = vld [vmem:[%s5327_s3 + $0x54] sm:$0xf0]  ;;  %v3031_v48 = vld [vmem:[%s5327_s3 + $0x58] sm:$0xf0]  ;;  %v765_v56 = vpop.f32.mrf.mxu1 }
  0xca   : > { %2639 = vst [vmem:[%s3817_s19 + $0x630] sm:$0xff] %v2095_v6  ;;  %v2110_v6 = vperm.slane %v4556_v45, 1  ;;  %1670 = vmatpush.bf16.msrb.mxu1 %v3226_v63  ;;  %v2120_v49 = vperm.slane %v4625_v14, 3  ;;  %v2121_v52 = vperm.slane %v4625_v14, 4  ;;  %v1889_v53 = vld [vmem:[%s5330_s6 + $0xc0] sm:$0xff]  ;;  %v2124_v57 = vperm.slane %v4625_v14, 7 }
  0xcb   : > { %2640 = vst [vmem:[%s3817_s19 + $0x638] sm:$0xff] %v2096_v11  ;;  %1632 = vmatpush.bf16.msra.mxu2 %v3150_v3  ;;  %v3158_v11 = vor.u32 %v3608_v8, %v3157_v5  ;;  %1645 = vmatpush.bf16.msra.mxu3 %v3154_v7  ;;  %v2125_v59 = vperm.slane %v1889_v53, 0  ;;  %v2126_v60 = vperm.slane %v1889_v53, 1  ;;  %v2127_v61 = vperm.slane %v1889_v53, 2  ;;  %v3485_v12 = vld [vmem:[%s5327_s3 + $0x3a0] sm:$0xf] }
  0xcc   : > { %2641 = vst [vmem:[%s3817_s19 + $0x640] sm:$0xff] %v2097_v15  ;;  %v2112_v15 = vperm.slane %v4556_v45, 3  ;;  %v2128_v63 = vperm.slane %v1889_v53, 3  ;;  %v2130_v3 = vperm.slane %v1889_v53, 5  ;;  %v2132_v8 = vperm.slane %v1889_v53, 7  ;;  %v4747_v23 = vld [vmem:[%s5330_s6 + $0xd0] sm:$0xff] }
  0xcd   : > { %2642 = vst [vmem:[%s3817_s19 + $0x648] sm:$0xff] %v2098_v19  ;;  %v2113_v19 = vperm.slane %v4556_v45, 4  ;;  %1658 = vmatpush.bf16.msrb.mxu0 %v3158_v11  ;;  %v3689_v13 = vld [vmem:[%s5327_s3 + $0x3dc] sm:$0xf0]  ;;  %v3487_v17 = vld [vmem:[%s5327_s3 + $0x3e0] sm:$0xf0] }
  0xce   : > { %2643 = vst [vmem:[%s3817_s19 + $0x650] sm:$0xff] %v2099_v24  ;;  %v2114_v24 = vperm.slane %v4556_v45, 5  ;;  %1671 = vmatpush.bf16.msrb.mxu1 %v3162_v16  ;;  %v3568_v45 = vld [vmem:[%s5327_s3 + $0x1c] sm:$0xf]  ;;  %v3681_v16 = vld [vmem:[%s5327_s3 + $0x3a4] sm:$0xf] }
  0xcf   : > { %2644 = vst [vmem:[%s3817_s19 + $0x658] sm:$0xff] %v2100_v28  ;;  %v3584_v28 = vld [vmem:[%s5327_s3 + $0x9c] sm:$0xf]  ;;  %1633 = vmatpush.bf16.msra.mxu2 %v3086_v20  ;;  %1646 = vmatpush.bf16.msra.mxu3 %v3090_v26  ;;  %v3034_v51 = vor.u32 %v3568_v45, %v3031_v48  ;;  %v3493_v20 = vld [vmem:[%s5327_s3 + $0x3a8] sm:$0xf] }
  0xd0   : > { %2645 = vst [vmem:[%s3817_s19 + $0x660] sm:$0xff] %v2101_v33  ;;  %v3021_v33 = vld [vmem:[%s5327_s3 + $0x10] sm:$0xf]  ;;  %v3098_v35 = vor.u32 %v3584_v28, %v3095_v32  ;;  %v754_v5 = vpop.f32.mrf.mxu0  ;;  %v3690_v22 = vld [vmem:[%s5327_s3 + $0x3e4] sm:$0xf0] }
  0xd1   : > { %2646 = vst [vmem:[%s3817_s19 + $0x668] sm:$0xff] %v2102_v37  ;;  %v3567_v37 = vld [vmem:[%s5327_s3 + $0x14] sm:$0xf]  ;;  %1659 = vmatpush.bf16.msrb.mxu0 %v3094_v31  ;;  %v3022_v39 = vor.u32 %v3575_v36, %v3021_v33  ;;  %v767_v7 = vpop.f32.mrf.mxu1  ;;  %v3682_v26 = vld [vmem:[%s5327_s3 + $0x3ac] sm:$0xf]  ;;  %v2147_v5 = vperm.slane %v4747_v23, 6 }
  0xd2   : > { %2647 = vst [vmem:[%s3817_s19 + $0x670] sm:$0xff] %v2103_v41  ;;  %v3029_v41 = vld [vmem:[%s5327_s3 + $0x18] sm:$0xf]  ;;  %1672 = vmatpush.bf16.msrb.mxu1 %v3098_v35  ;;  %v3026_v43 = vor.u32 %v3567_v37, %v3023_v40  ;;  %v3495_v27 = vld [vmem:[%s5327_s3 + $0x3e8] sm:$0xf0]  ;;  %v3490_v35 = vor.u32 %v3681_v16, %v3487_v17 }
  0xd3   : > { %2648 = vst [vmem:[%s3817_s19 + $0x678] sm:$0xff] %v2104_v46  ;;  %v2119_v46 = vperm.slane %v4625_v14, 2  ;;  %1634 = vmatpush.bf16.msra.mxu2 %v3022_v39  ;;  %v3030_v47 = vor.u32 %v3576_v44, %v3029_v41  ;;  %v3673_v31 = vld [vmem:[%s5327_s3 + $0x35c] sm:$0xf0]  ;;  %v3665_v36 = vld [vmem:[%s5327_s3 + $0x324] sm:$0xf]  ;;  %v3494_v39 = vor.u32 %v3690_v22, %v3493_v20  ;;  %v3498_v40 = vor.u32 %v3682_v26, %v3495_v27 }
  0xd4   : > { %2649 = vst [vmem:[%s3817_s19 + $0x680] sm:$0xff] %v2105_v50  ;;  %v701_v50 = vadd.f32 %v3703_v25, %v4376_v21  ;;  %1647 = vmatpush.bf16.msra.mxu3 %v3026_v43  ;;  %v2123_v21 = vperm.slane %v4625_v14, 6  ;;  %v3423_v37 = vld [vmem:[%s5327_s3 + $0x360] sm:$0xf0]  ;;  %v3429_v41 = vld [vmem:[%s5327_s3 + $0x328] sm:$0xf] }
  0xd5   : > { %2650 = vst [vmem:[%s3817_s19 + $0x688] sm:$0xff] %v2106_v54  ;;  %1660 = vmatpush.bf16.msrb.mxu0 %v3030_v47  ;;  %v2122_v54 = vperm.slane %v4625_v14, 5  ;;  %v3666_v44 = vld [vmem:[%s5327_s3 + $0x32c] sm:$0xf]  ;;  %v3357_v47 = vld [vmem:[%s5327_s3 + $0x2a0] sm:$0xf] }
  0xd6   : > { %2651 = vst [vmem:[%s3817_s19 + $0x690] sm:$0xff] %v2107_v58  ;;  %1673 = vmatpush.bf16.msrb.mxu1 %v3034_v51  ;;  %v714_v58 = vadd.f32 %v4394_v29, %v701_v50  ;;  %v2129_v29 = vperm.slane %v1889_v53, 4  ;;  %v3431_v45 = vld [vmem:[%s5327_s3 + $0x368] sm:$0xf0]  ;;  %v3657_v48 = vld [vmem:[%s5327_s3 + $0x2dc] sm:$0xf0]  ;;  %v3426_v51 = vor.u32 %v3665_v36, %v3423_v37 }
  0xd7   : > { %2652 = vst [vmem:[%s3817_s19 + $0x698] sm:$0xff] %v2108_v62  ;;  %v726_v62 = vpop.f32.mrf.mxu2  ;;  %v3231_v20 = vld [vmem:[%s5327_s3 + $0x1e0] sm:$0xf0]  ;;  %v3626_v26 = vld [vmem:[%s5327_s3 + $0x1e4] sm:$0xf0] }
  0xd8   : > { %2653 = vst [vmem:[%s3817_s19 + $0x6a0] sm:$0xff] %v2109_v2  ;;  %v727_v0 = vadd.f32 %v726_v62, %v714_v58  ;;  %v4713_v2 = vld [vmem:[%s5330_s6 + $0xc8] sm:$0xff]  ;;  %v4821_v58 = vld [vmem:[%s5330_s6 + $0xd8] sm:$0xff]  ;;  %v2145_v62 = vperm.slane %v4747_v23, 4  ;;  %v4890_v27 = vld [vmem:[%s5330_s6 + $0xe0] sm:$0xff] }
  0xd9   : > { %2654 = vst [vmem:[%s3817_s19 + $0x6a8] sm:$0xff] %v2110_v6  ;;  %v2131_v6 = vperm.slane %v1889_v53, 6  ;;  %v2133_v9 = vperm.slane %v4713_v2, 0  ;;  %v2134_v11 = vperm.slane %v4713_v2, 1  ;;  %v2135_v14 = vperm.slane %v4713_v2, 2 }
  0xda   : > { %2655 = vst [vmem:[%s3817_s19 + $0x6b0] sm:$0xff] %v2111_v10  ;;  %v740_v4 = vadd.f32 %v739_v1, %v727_v0  ;;  %v2136_v18 = vperm.slane %v4713_v2, 3  ;;  %v2137_v28 = vperm.slane %v4713_v2, 4  ;;  %v2138_v32 = vperm.slane %v4713_v2, 5  ;;  %v3359_v53 = vld [vmem:[%s5327_s3 + $0x2e0] sm:$0xf0] }
  0xdb   : > { %2656 = vst [vmem:[%s3817_s19 + $0x6b8] sm:$0xff] %v2112_v15  ;;  %v2140_v43 = vperm.slane %v4713_v2, 7  ;;  %v3641_v0 = vld [vmem:[%s5327_s3 + $0x25c] sm:$0xf0]  ;;  %v2146_v1 = vperm.slane %v4747_v23, 5  ;;  %v2150_v16 = vperm.slane %v4821_v58, 1 }
  0xdc   : > { %2657 = vst [vmem:[%s3817_s19 + $0x6c0] sm:$0xff] %v2113_v19  ;;  %v753_v10 = vadd.f32 %v752_v55, %v740_v4  ;;  %v3295_v4 = vld [vmem:[%s5327_s3 + $0x260] sm:$0xf0]  ;;  %v2151_v22 = vperm.slane %v4821_v58, 2  ;;  %v2154_v36 = vperm.slane %v4821_v58, 5 }
  0xdd   : > { %2658 = vst [vmem:[%s3817_s19 + $0x6c8] sm:$0xff] %v2114_v24  ;;  %v741_v24 = vpop.f32.mrf.mxu3 }
  0xde   : > { %2659 = vst [vmem:[%s3817_s19 + $0x6d0] sm:$0xff] %v2115_v30  ;;  %v766_v15 = vadd.f32 %v765_v56, %v753_v10  ;;  %v3421_v30 = vld [vmem:[%s5327_s3 + $0x320] sm:$0xf]  ;;  %v3365_v56 = vld [vmem:[%s5327_s3 + $0x2a8] sm:$0xf]  ;;  %v2148_v10 = vperm.slane %v4747_v23, 7 }
  0xdf   : > { %2660 = vst [vmem:[%s3817_s19 + $0x6d8] sm:$0xff] %v2116_v34  ;;  %v728_v19 = vpop.f32.mrf.mxu2  ;;  %v3486_v34 = vor.u32 %v3689_v13, %v3485_v12  ;;  %v3422_v50 = vor.u32 %v3673_v31, %v3421_v30  ;;  %v3303_v12 = vld [vmem:[%s5327_s3 + $0x268] sm:$0xf0]  ;;  %v2149_v13 = vperm.slane %v4821_v58, 0 }
  0xe0   : > { %2661 = vst [vmem:[%s3817_s19 + $0x6e0] sm:$0xff] %v2117_v38  ;;  %v769_v25 = vmax.f32 %v766_v15, 0.0  ;;  %v2139_v38 = vperm.slane %v4713_v2, 6  ;;  %v3358_v2 = vor.u32 %v3657_v48, %v3357_v47  ;;  %v3625_v15 = vld [vmem:[%s5327_s3 + $0x1dc] sm:$0xf0] }
  0xe1   : > { %2662 = vst [vmem:[%s3817_s19 + $0x6e8] sm:$0xff] %v2118_v42  ;;  %v3674_v42 = vld [vmem:[%s5327_s3 + $0x364] sm:$0xf0]  ;;  %v3617_v19 = vld [vmem:[%s5327_s3 + $0x1a4] sm:$0xf] }
  0xe2   : > { %2663 = vst [vmem:[%s3817_s19 + $0x6f0] sm:$0xff] %v2119_v46  ;;  %v4766_v33 = vpack.c.bf16 %v769_v25, %v769_v25  ;;  %v2141_v46 = vperm.slane %v4747_v23, 0  ;;  %v3430_v55 = vor.u32 %v3674_v42, %v3429_v41  ;;  %v3237_v25 = vld [vmem:[%s5327_s3 + $0x1a8] sm:$0xf]  ;;  %v3618_v30 = vld [vmem:[%s5327_s3 + $0x1ac] sm:$0xf] }
  0xe3   : > { %2664 = vst [vmem:[%s3817_s19 + $0x6f8] sm:$0xff] %v2120_v49  ;;  %v2142_v49 = vperm.slane %v4747_v23, 1  ;;  %v3239_v31 = vld [vmem:[%s5327_s3 + $0x1e8] sm:$0xf0]  ;;  %v2155_v41 = vperm.slane %v4821_v58, 6  ;;  %v3238_v42 = vor.u32 %v3626_v26, %v3237_v25 }
  0xe4   : > { %2665 = vst [vmem:[%s3817_s19 + $0x700] sm:$0xff] %v2121_v52  ;;  %1583 = vmatmul.bf16.vlgmr.msrb.gmra.mxu2 %v4766_v33  ;;  %1596 = vmatmul.bf16.vlgmr.msrb.gmra.mxu3 %v4766_v33  ;;  %v3649_v52 = vld [vmem:[%s5327_s3 + $0x2a4] sm:$0xf]  ;;  %v3602_v47 = vld [vmem:[%s5327_s3 + $0x12c] sm:$0xf] }
  0xe5   : > { %2666 = vst [vmem:[%s3817_s19 + $0x708] sm:$0xff] %v2122_v54  ;;  %1609 = vmatmul.bf16.vlgmr.msra.gmra.mxu0 %v4766_v33  ;;  %1622 = vmatmul.bf16.vlgmr.msra.gmra.mxu1 %v4766_v33  ;;  %v2143_v54 = vperm.slane %v4747_v23, 2  ;;  %v3175_v48 = vld [vmem:[%s5327_s3 + $0x168] sm:$0xf0] }
  0xe6   : > { %2667 = vst [vmem:[%s3817_s19 + $0x710] sm:$0xff] %v2123_v21  ;;  %1679 = vmatpush.bf16.msrb.mxu2 %v3486_v34  ;;  %1692 = vmatpush.bf16.msrb.mxu3 %v3490_v35  ;;  %v3434_v21 = vor.u32 %v3666_v44, %v3431_v45  ;;  %v3165_v34 = vld [vmem:[%s5327_s3 + $0x120] sm:$0xf]  ;;  %v3173_v44 = vld [vmem:[%s5327_s3 + $0x128] sm:$0xf] }
  0xe7   : > { %2668 = vst [vmem:[%s3817_s19 + $0x718] sm:$0xff] %v2124_v57  ;;  %1705 = vmatpush.bf16.msra.mxu0 %v3494_v39  ;;  %1718 = vmatpush.bf16.msra.mxu1 %v3498_v40  ;;  %v3658_v57 = vld [vmem:[%s5327_s3 + $0x2e4] sm:$0xf0]  ;;  %v3609_v35 = vld [vmem:[%s5327_s3 + $0x15c] sm:$0xf0] }
  0xe8   : > { %2669 = vst [vmem:[%s3817_s19 + $0x720] sm:$0xff] %v2125_v59  ;;  %v2144_v59 = vperm.slane %v4747_v23, 3  ;;  %v3601_v39 = vld [vmem:[%s5327_s3 + $0x124] sm:$0xf]  ;;  %v3610_v45 = vld [vmem:[%s5327_s3 + $0x164] sm:$0xf0] }
  0xe9   : > { %2670 = vst [vmem:[%s3817_s19 + $0x728] sm:$0xff] %v2126_v60  ;;  %v3650_v60 = vld [vmem:[%s5327_s3 + $0x2ac] sm:$0xf]  ;;  %v3167_v40 = vld [vmem:[%s5327_s3 + $0x160] sm:$0xf0] }
  0xea   : > { %2671 = vst [vmem:[%s3817_s19 + $0x730] sm:$0xff] %v2127_v61  ;;  %v3367_v61 = vld [vmem:[%s5327_s3 + $0x2e8] sm:$0xf0]  ;;  %1680 = vmatpush.bf16.msrb.mxu2 %v3422_v50  ;;  %1693 = vmatpush.bf16.msrb.mxu3 %v3426_v51  ;;  %v3101_v50 = vld [vmem:[%s5327_s3 + $0xa0] sm:$0xf] }
  0xeb   : > { %2672 = vst [vmem:[%s3817_s19 + $0x738] sm:$0xff] %v2128_v63  ;;  %v3293_v63 = vld [vmem:[%s5327_s3 + $0x220] sm:$0xf]  ;;  %1706 = vmatpush.bf16.msra.mxu0 %v3430_v55  ;;  %1719 = vmatpush.bf16.msra.mxu1 %v3434_v21  ;;  %v3370_v7 = vor.u32 %v3650_v60, %v3367_v61  ;;  %v3585_v55 = vld [vmem:[%s5327_s3 + $0xa4] sm:$0xf]  ;;  %v4963_v61 = vld [vmem:[%s5330_s6 + $0xe8] sm:$0xff] }
  0xec   : > { %2673 = vst [vmem:[%s3817_s19 + $0x740] sm:$0xff] %v2129_v29  ;;  %v3362_v29 = vor.u32 %v3649_v52, %v3359_v53  ;;  %v3294_v17 = vor.u32 %v3641_v0, %v3293_v63  ;;  %v3593_v51 = vld [vmem:[%s5327_s3 + $0xdc] sm:$0xf0]  ;;  %v2158_v52 = vperm.slane %v4890_v27, 1  ;;  %v3166_v53 = vor.u32 %v3609_v35, %v3165_v34  ;;  %v3103_v21 = vld [vmem:[%s5327_s3 + $0xe0] sm:$0xf0] }
  0xed   : > { %2674 = vst [vmem:[%s3817_s19 + $0x748] sm:$0xff] %v2130_v3  ;;  %v3633_v3 = vld [vmem:[%s5327_s3 + $0x224] sm:$0xf]  ;;  %v3594_v60 = vld [vmem:[%s5327_s3 + $0xe4] sm:$0xf0] }
  0xee   : > { %2675 = vst [vmem:[%s3817_s19 + $0x750] sm:$0xff] %v2131_v6  ;;  %v3366_v6 = vor.u32 %v3658_v57, %v3365_v56  ;;  %1681 = vmatpush.bf16.msrb.mxu2 %v3358_v2  ;;  %1694 = vmatpush.bf16.msrb.mxu3 %v3362_v29  ;;  %v2159_v56 = vperm.slane %v4890_v27, 2  ;;  %v3174_v57 = vor.u32 %v3610_v45, %v3173_v44  ;;  %v3586_v63 = vld [vmem:[%s5327_s3 + $0xac] sm:$0xf]  ;;  %v3037_v2 = vld [vmem:[%s5327_s3 + $0x20] sm:$0xf] }
  0xef   : > { %2676 = vst [vmem:[%s3817_s19 + $0x758] sm:$0xff] %v2132_v8  ;;  %v3301_v8 = vld [vmem:[%s5327_s3 + $0x228] sm:$0xf]  ;;  %1720 = vmatpush.bf16.msra.mxu1 %v3370_v7  ;;  %v3111_v0 = vld [vmem:[%s5327_s3 + $0xe8] sm:$0xf0]  ;;  %v3106_v7 = vor.u32 %v3585_v55, %v3103_v21 }
  0xf0   : > { %2677 = vst [vmem:[%s3817_s19 + $0x760] sm:$0xff] %v2133_v9  ;;  %v3642_v9 = vld [vmem:[%s5327_s3 + $0x264] sm:$0xf0]  ;;  %1707 = vmatpush.bf16.msra.mxu0 %v3366_v6  ;;  %v3577_v29 = vld [vmem:[%s5327_s3 + $0x5c] sm:$0xf0]  ;;  %v3102_v6 = vor.u32 %v3593_v51, %v3101_v50  ;;  %v2171_v50 = vperm.slane %v4963_v61, 6 }
  0xf1   : > { %2678 = vst [vmem:[%s3817_s19 + $0x768] sm:$0xff] %v2134_v11  ;;  %v3634_v11 = vld [vmem:[%s5327_s3 + $0x22c] sm:$0xf]  ;;  %v3302_v23 = vor.u32 %v3642_v9, %v3301_v8  ;;  %v3045_v8 = vld [vmem:[%s5327_s3 + $0x28] sm:$0xf]  ;;  %v3038_v25 = vor.u32 %v3577_v29, %v3037_v2 }
  0xf2   : > { %2679 = vst [vmem:[%s3817_s19 + $0x770] sm:$0xff] %v2135_v14  ;;  %v3229_v14 = vld [vmem:[%s5327_s3 + $0x1a0] sm:$0xf]  ;;  %v3306_v24 = vor.u32 %v3634_v11, %v3303_v12  ;;  %1682 = vmatpush.bf16.msrb.mxu2 %v3294_v17  ;;  %v3578_v9 = vld [vmem:[%s5327_s3 + $0x64] sm:$0xf0]  ;;  %v2163_v12 = vperm.slane %v4890_v27, 6 }
  0xf3   : > { %2680 = vst [vmem:[%s3817_s19 + $0x778] sm:$0xff] %v2136_v18  ;;  %v3298_v18 = vor.u32 %v3633_v3, %v3295_v4  ;;  %v3230_v37 = vor.u32 %v3625_v15, %v3229_v14  ;;  %v3569_v3 = vld [vmem:[%s5327_s3 + $0x24] sm:$0xf]  ;;  %v3047_v11 = vld [vmem:[%s5327_s3 + $0x68] sm:$0xf0]  ;;  %v3114_v14 = vor.u32 %v3586_v63, %v3111_v0  ;;  %v2164_v17 = vperm.slane %v4890_v27, 7 }
  0xf4   : > { %2681 = vst [vmem:[%s3817_s19 + $0x780] sm:$0xff] %v2137_v28  ;;  %v2152_v28 = vperm.slane %v4821_v58, 3  ;;  %1708 = vmatpush.bf16.msra.mxu0 %v3302_v23  ;;  %1721 = vmatpush.bf16.msra.mxu1 %v3306_v24  ;;  %v3039_v4 = vld [vmem:[%s5327_s3 + $0x60] sm:$0xf0]  ;;  %v3501_v15 = vld [vmem:[%s5327_s3 + $0x3b0] sm:$0xf] }
  0xf5   : > { %2682 = vst [vmem:[%s3817_s19 + $0x788] sm:$0xff] %v2138_v32  ;;  %v2153_v32 = vperm.slane %v4821_v58, 4  ;;  %1695 = vmatpush.bf16.msrb.mxu3 %v3298_v18  ;;  %1635 = vmatmul.bf16.vlgmr.msra.gmra.mxu2 %v4766_v33  ;;  %v3683_v18 = vld [vmem:[%s5327_s3 + $0x3b4] sm:$0xf]  ;;  %v3692_v23 = vld [vmem:[%s5327_s3 + $0x3f4] sm:$0xf0]  ;;  %v3042_v26 = vor.u32 %v3569_v3, %v3039_v4 }
  0xf6   : > { %2683 = vst [vmem:[%s3817_s19 + $0x790] sm:$0xff] %v2139_v38  ;;  %v3234_v38 = vor.u32 %v3617_v19, %v3231_v20  ;;  %1648 = vmatmul.bf16.vlgmr.msra.gmra.mxu3 %v4766_v33  ;;  %1661 = vmatmul.bf16.vlgmr.msrb.gmra.mxu0 %v4766_v33  ;;  %v3503_v19 = vld [vmem:[%s5327_s3 + $0x3f0] sm:$0xf0]  ;;  %v2165_v20 = vperm.slane %v4963_v61, 0  ;;  %v2166_v24 = vperm.slane %v4963_v61, 1  ;;  %v5117_v3 = vld [vmem:[%s5330_s6 + $0xf8] sm:$0xff] }
  0xf7   : > { %2684 = vst [vmem:[%s3817_s19 + $0x798] sm:$0xff] %v2140_v43  ;;  %v3242_v43 = vor.u32 %v3618_v30, %v3239_v31  ;;  %1674 = vmatmul.bf16.vlgmr.msrb.gmra.mxu1 %v4766_v33  ;;  %1683 = vmatpush.bf16.msrb.mxu2 %v3230_v37  ;;  %v2167_v30 = vperm.slane %v4963_v61, 2  ;;  %v3046_v31 = vor.u32 %v3578_v9, %v3045_v8  ;;  %v3437_v34 = vld [vmem:[%s5327_s3 + $0x330] sm:$0xf]  ;;  %v2168_v37 = vperm.slane %v4963_v61, 3 }
  0xf8   : > { %2685 = vst [vmem:[%s3817_s19 + $0x7a0] sm:$0xff] %v2141_v46  ;;  %v2156_v46 = vperm.slane %v4821_v58, 7  ;;  %1709 = vmatpush.bf16.msra.mxu0 %v3238_v42  ;;  %v3178_v58 = vor.u32 %v3602_v47, %v3175_v48  ;;  %v3675_v35 = vld [vmem:[%s5327_s3 + $0x36c] sm:$0xf0]  ;;  %v2169_v42 = vperm.slane %v4963_v61, 4  ;;  %v2170_v47 = vperm.slane %v4963_v61, 5 }
  0xf9   : > { %2686 = vst [vmem:[%s3817_s19 + $0x7a8] sm:$0xff] %v2142_v49  ;;  %v2157_v49 = vperm.slane %v4890_v27, 0  ;;  %1696 = vmatpush.bf16.msrb.mxu3 %v3234_v38  ;;  %1722 = vmatpush.bf16.msra.mxu1 %v3242_v43  ;;  %v3445_v45 = vld [vmem:[%s5327_s3 + $0x338] sm:$0xf]  ;;  %v3668_v48 = vld [vmem:[%s5327_s3 + $0x33c] sm:$0xf] }
  0xfa   : > { %2687 = vst [vmem:[%s3817_s19 + $0x7b0] sm:$0xff] %v2143_v54  ;;  %v3170_v54 = vor.u32 %v3601_v39, %v3167_v40  ;;  %v3506_v39 = vor.u32 %v3683_v18, %v3503_v19  ;;  %v3667_v40 = vld [vmem:[%s5327_s3 + $0x334] sm:$0xf]  ;;  %v3373_v51 = vld [vmem:[%s5327_s3 + $0x2b0] sm:$0xf] }
  0xfb   : > { %2688 = vst [vmem:[%s3817_s19 + $0x7b8] sm:$0xff] %v2144_v59  ;;  %v3109_v59 = vld [vmem:[%s5327_s3 + $0xa8] sm:$0xf]  ;;  %1684 = vmatpush.bf16.msrb.mxu2 %v3166_v53  ;;  %v2172_v53 = vperm.slane %v4963_v61, 7  ;;  %v3651_v21 = vld [vmem:[%s5327_s3 + $0x2b4] sm:$0xf] }
  0xfc   : > { %2689 = vst [vmem:[%s3817_s19 + $0x7c0] sm:$0xff] %v2145_v62  ;;  %v2160_v62 = vperm.slane %v4890_v27, 3  ;;  %1710 = vmatpush.bf16.msra.mxu0 %v3174_v57  ;;  %v3660_v61 = vld [vmem:[%s5327_s3 + $0x2f4] sm:$0xf0]  ;;  %v3652_v63 = vld [vmem:[%s5327_s3 + $0x2bc] sm:$0xf] }
  0xfd   : > { %2690 = vst [vmem:[%s3817_s19 + $0x7c8] sm:$0xff] %v2146_v1  ;;  %v2161_v1 = vperm.slane %v4890_v27, 4  ;;  %1697 = vmatpush.bf16.msrb.mxu3 %v3170_v54  ;;  %1723 = vmatpush.bf16.msra.mxu1 %v3178_v58  ;;  %v3438_v54 = vor.u32 %v3675_v35, %v3437_v34  ;;  %v3383_v0 = vld [vmem:[%s5327_s3 + $0x2f8] sm:$0xf0]  ;;  %v3309_v2 = vld [vmem:[%s5327_s3 + $0x230] sm:$0xf] }
  0xfe   : > { %2691 = vst [vmem:[%s3817_s19 + $0x7d0] sm:$0xff] %v2147_v5  ;;  %v2162_v5 = vperm.slane %v4890_v27, 5  ;;  %v3684_v27 = vld [vmem:[%s5327_s3 + $0x3bc] sm:$0xf]  ;;  %v3643_v29 = vld [vmem:[%s5327_s3 + $0x26c] sm:$0xf0] }
  0xff   : > { %2692 = vst [vmem:[%s3817_s19 + $0x7d8] sm:$0xff] %v2148_v10  ;;  %v3570_v10 = vld [vmem:[%s5327_s3 + $0x2c] sm:$0xf]  ;;  %1685 = vmatpush.bf16.msrb.mxu2 %v3102_v6  ;;  %v3311_v8 = vld [vmem:[%s5327_s3 + $0x270] sm:$0xf0] }
 0x100   : > { %2693 = vst [vmem:[%s3817_s19 + $0x7e0] sm:$0xff] %v2149_v13  ;;  %v3110_v13 = vor.u32 %v3594_v60, %v3109_v59  ;;  %v3381_v60 = vld [vmem:[%s5327_s3 + $0x2b8] sm:$0xf]  ;;  %v3245_v18 = vld [vmem:[%s5327_s3 + $0x1b0] sm:$0xf] }
 0x101   : > { %2694 = vst [vmem:[%s3817_s19 + $0x7e8] sm:$0xff] %v2150_v16  ;;  %v3691_v16 = vld [vmem:[%s5327_s3 + $0x3ec] sm:$0xf0]  ;;  %1698 = vmatpush.bf16.msrb.mxu3 %v3106_v7  ;;  %1724 = vmatpush.bf16.msra.mxu1 %v3114_v14  ;;  %v3635_v7 = vld [vmem:[%s5327_s3 + $0x234] sm:$0xf] }
 0x102   : > { %2695 = vst [vmem:[%s3817_s19 + $0x7f0] sm:$0xff] %v2151_v22  ;;  %v3509_v22 = vld [vmem:[%s5327_s3 + $0x3b8] sm:$0xf]  ;;  %1711 = vmatpush.bf16.msra.mxu0 %v3110_v13  ;;  %v3502_v38 = vor.u32 %v3691_v16, %v3501_v15  ;;  %v3636_v15 = vld [vmem:[%s5327_s3 + $0x23c] sm:$0xf] }
 0x103   : > { %2696 = vst [vmem:[%s3817_s19 + $0x7f8] sm:$0xff] %v2152_v28  ;;  %v3511_v28 = vld [vmem:[%s5327_s3 + $0x3f8] sm:$0xf0]  ;;  %v3510_v43 = vor.u32 %v3692_v23, %v3509_v22  ;;  %1686 = vmatpush.bf16.msrb.mxu2 %v3038_v25  ;;  %v3644_v13 = vld [vmem:[%s5327_s3 + $0x274] sm:$0xf0]  ;;  %v3310_v22 = vor.u32 %v3643_v29, %v3309_v2  ;;  %v3314_v23 = vor.u32 %v3635_v7, %v3311_v8 }
 0x104   : > { %2697 = vst [vmem:[%s3817_s19 + $0x800] sm:$0xff] %v2153_v32  ;;  %v3050_v32 = vor.u32 %v3570_v10, %v3047_v11  ;;  %v3514_v44 = vor.u32 %v3684_v27, %v3511_v28  ;;  %v3382_v10 = vor.u32 %v3660_v61, %v3381_v60  ;;  %v3386_v11 = vor.u32 %v3652_v63, %v3383_v0  ;;  %v3319_v16 = vld [vmem:[%s5327_s3 + $0x278] sm:$0xf0]  ;;  %v3627_v19 = vld [vmem:[%s5327_s3 + $0x1ec] sm:$0xf0] }
 0x105   : > { %2698 = vst [vmem:[%s3817_s19 + $0x808] sm:$0xff] %v2154_v36  ;;  %v5044_v36 = vld [vmem:[%s5330_s6 + $0xf0] sm:$0xff]  ;;  %1699 = vmatpush.bf16.msrb.mxu3 %v3042_v26  ;;  %v2181_v26 = vperm.slane %v5117_v3, 0  ;;  %v3322_v28 = vor.u32 %v3636_v15, %v3319_v16  ;;  %v3620_v34 = vld [vmem:[%s5327_s3 + $0x1bc] sm:$0xf] }
 0x106   : > { %2699 = vst [vmem:[%s3817_s19 + $0x810] sm:$0xff] %v2155_v41  ;;  %v3439_v41 = vld [vmem:[%s5327_s3 + $0x370] sm:$0xf0]  ;;  %1712 = vmatpush.bf16.msra.mxu0 %v3046_v31  ;;  %1725 = vmatpush.bf16.msra.mxu1 %v3050_v32  ;;  %v2173_v57 = vperm.slane %v5044_v36, 0  ;;  %v2176_v4 = vperm.slane %v5044_v36, 3  ;;  %v2177_v9 = vperm.slane %v5044_v36, 4 }
 0x107   : > { %2700 = vst [vmem:[%s3817_s19 + $0x818] sm:$0xff] %v2156_v46  ;;  %v3676_v46 = vld [vmem:[%s5327_s3 + $0x374] sm:$0xf0]  ;;  %1731 = vmatpush.bf16.msra.mxu2 %v3502_v38  ;;  %v3442_v55 = vor.u32 %v3667_v40, %v3439_v41  ;;  %v2178_v14 = vperm.slane %v5044_v36, 5  ;;  %v3247_v25 = vld [vmem:[%s5327_s3 + $0x1f0] sm:$0xf0]  ;;  %v3246_v41 = vor.u32 %v3627_v19, %v3245_v18 }
 0x108   : > { %2701 = vst [vmem:[%s3817_s19 + $0x820] sm:$0xff] %v2157_v49  ;;  %v3447_v49 = vld [vmem:[%s5327_s3 + $0x378] sm:$0xf0]  ;;  %v3446_v58 = vor.u32 %v3676_v46, %v3445_v45  ;;  %1687 = vmatmul.bf16.vlgmr.msrb.gmra.mxu2 %v4766_v33  ;;  %1700 = vmatmul.bf16.vlgmr.msrb.gmra.mxu3 %v4766_v33  ;;  %v3628_v31 = vld [vmem:[%s5327_s3 + $0x1f4] sm:$0xf0]  ;;  %v2182_v32 = vperm.slane %v5117_v3, 1 }
 0x109   : > { %2702 = vst [vmem:[%s3817_s19 + $0x828] sm:$0xff] %v2158_v52  ;;  %v3659_v52 = vld [vmem:[%s5327_s3 + $0x2ec] sm:$0xf0]  ;;  %1744 = vmatpush.bf16.msra.mxu3 %v3506_v39  ;;  %v3450_v59 = vor.u32 %v3668_v48, %v3447_v49  ;;  %1713 = vmatmul.bf16.vlgmr.msra.gmra.mxu0 %v4766_v33  ;;  %v3255_v35 = vld [vmem:[%s5327_s3 + $0x1f8] sm:$0xf0]  ;;  %v5186_v39 = vld [vmem:[%s5330_s6 + $0x100] sm:$0xff] }
 0x10a   : > { %2703 = vst [vmem:[%s3817_s19 + $0x830] sm:$0xff] %v2159_v56  ;;  %v3375_v56 = vld [vmem:[%s5327_s3 + $0x2f0] sm:$0xf0]  ;;  %1757 = vmatpush.bf16.msrb.mxu0 %v3510_v43  ;;  %1770 = vmatpush.bf16.msrb.mxu1 %v3514_v44  ;;  %v3611_v38 = vld [vmem:[%s5327_s3 + $0x16c] sm:$0xf0]  ;;  %v2184_v40 = vperm.slane %v5117_v3, 3 }
 0x10b   : > { %2704 = vst [vmem:[%s3817_s19 + $0x838] sm:$0xff] %v2160_v62  ;;  %v2174_v62 = vperm.slane %v5044_v36, 1  ;;  %1726 = vmatmul.bf16.vlgmr.msra.gmra.mxu1 %v4766_v33  ;;  %1732 = vmatpush.bf16.msra.mxu2 %v3438_v54  ;;  %v3378_v6 = vor.u32 %v3651_v21, %v3375_v56  ;;  %v3603_v43 = vld [vmem:[%s5327_s3 + $0x134] sm:$0xf]  ;;  %v2185_v45 = vperm.slane %v5117_v3, 4  ;;  %v2188_v21 = vperm.slane %v5117_v3, 7 }
 0x10c   : > { %2705 = vst [vmem:[%s3817_s19 + $0x840] sm:$0xff] %v2161_v1  ;;  %v2175_v1 = vperm.slane %v5044_v36, 2  ;;  %v3183_v44 = vld [vmem:[%s5327_s3 + $0x170] sm:$0xf0]  ;;  %v3189_v48 = vld [vmem:[%s5327_s3 + $0x138] sm:$0xf] }
 0x10d   : > { %2706 = vst [vmem:[%s3817_s19 + $0x848] sm:$0xff] %v2162_v5  ;;  %1745 = vmatpush.bf16.msra.mxu3 %v3442_v55  ;;  %v3374_v5 = vor.u32 %v3659_v52, %v3373_v51  ;;  %v3612_v49 = vld [vmem:[%s5327_s3 + $0x174] sm:$0xf0]  ;;  %v3604_v51 = vld [vmem:[%s5327_s3 + $0x13c] sm:$0xf]  ;;  %v2189_v60 = vperm.slane %v5186_v39, 0 }
 0x10e   : > { %2707 = vst [vmem:[%s3817_s19 + $0x850] sm:$0xff] %v2163_v12  ;;  %1758 = vmatpush.bf16.msrb.mxu0 %v3446_v58  ;;  %1771 = vmatpush.bf16.msrb.mxu1 %v3450_v59  ;;  %v3317_v12 = vld [vmem:[%s5327_s3 + $0x238] sm:$0xf]  ;;  %v3191_v52 = vld [vmem:[%s5327_s3 + $0x178] sm:$0xf0]  ;;  %v3190_v61 = vor.u32 %v3612_v49, %v3189_v48  ;;  %v2192_v7 = vperm.slane %v5186_v39, 3 }
 0x10f   : > { %2708 = vst [vmem:[%s3817_s19 + $0x858] sm:$0xff] %v2164_v17  ;;  %v2179_v17 = vperm.slane %v5044_v36, 6  ;;  %1733 = vmatpush.bf16.msra.mxu2 %v3374_v5  ;;  %v3318_v27 = vor.u32 %v3644_v13, %v3317_v12  ;;  %v3117_v54 = vld [vmem:[%s5327_s3 + $0xb0] sm:$0xf]  ;;  %v3587_v58 = vld [vmem:[%s5327_s3 + $0xb4] sm:$0xf] }
 0x110   : > { %2709 = vst [vmem:[%s3817_s19 + $0x860] sm:$0xff] %v2165_v20  ;;  %v2180_v20 = vperm.slane %v5044_v36, 7  ;;  %v2183_v36 = vperm.slane %v5117_v3, 2  ;;  %v3595_v55 = vld [vmem:[%s5327_s3 + $0xec] sm:$0xf0]  ;;  %v2193_v12 = vperm.slane %v5186_v39, 4 }
 0x111   : > { %2710 = vst [vmem:[%s3817_s19 + $0x868] sm:$0xff] %v2166_v24  ;;  %1746 = vmatpush.bf16.msra.mxu3 %v3378_v6  ;;  %v3619_v24 = vld [vmem:[%s5327_s3 + $0x1b4] sm:$0xf]  ;;  %v3125_v63 = vld [vmem:[%s5327_s3 + $0xb8] sm:$0xf]  ;;  %v1898_v6 = vld [vmem:[%s5330_s6 + $0x108] sm:$0xff]  ;;  %v3118_v8 = vor.u32 %v3595_v55, %v3117_v54 }
 0x112   : > { %2711 = vst [vmem:[%s3817_s19 + $0x870] sm:$0xff] %v2167_v30  ;;  %1759 = vmatpush.bf16.msrb.mxu0 %v3382_v10  ;;  %1772 = vmatpush.bf16.msrb.mxu1 %v3386_v11  ;;  %v3253_v30 = vld [vmem:[%s5327_s3 + $0x1b8] sm:$0xf]  ;;  %v3119_v59 = vld [vmem:[%s5327_s3 + $0xf0] sm:$0xf0] }
 0x113   : > { %2712 = vst [vmem:[%s3817_s19 + $0x878] sm:$0xff] %v2168_v37  ;;  %v3181_v37 = vld [vmem:[%s5327_s3 + $0x130] sm:$0xf]  ;;  %1734 = vmatpush.bf16.msra.mxu2 %v3310_v22  ;;  %v3254_v46 = vor.u32 %v3628_v31, %v3253_v30  ;;  %v3596_v0 = vld [vmem:[%s5327_s3 + $0xf4] sm:$0xf0]  ;;  %v2196_v22 = vperm.slane %v5186_v39, 7 }
 0x114   : > { %2713 = vst [vmem:[%s3817_s19 + $0x880] sm:$0xff] %v2169_v42  ;;  %v3250_v42 = vor.u32 %v3619_v24, %v3247_v25  ;;  %v3182_v56 = vor.u32 %v3611_v38, %v3181_v37  ;;  %v3588_v2 = vld [vmem:[%s5327_s3 + $0xbc] sm:$0xf]  ;;  %v3579_v5 = vld [vmem:[%s5327_s3 + $0x6c] sm:$0xf0]  ;;  %v3126_v13 = vor.u32 %v3596_v0, %v3125_v63  ;;  %v2197_v25 = vperm.slane %v1898_v6, 0 }
 0x115   : > { %2714 = vst [vmem:[%s3817_s19 + $0x888] sm:$0xff] %v2170_v47  ;;  %1747 = vmatpush.bf16.msra.mxu3 %v3314_v23  ;;  %v3258_v47 = vor.u32 %v3620_v34, %v3255_v35  ;;  %v3127_v29 = vld [vmem:[%s5327_s3 + $0xf8] sm:$0xf0]  ;;  %v3571_v10 = vld [vmem:[%s5327_s3 + $0x34] sm:$0xf]  ;;  %v2199_v30 = vperm.slane %v1898_v6, 2 }
 0x116   : > { %2715 = vst [vmem:[%s3817_s19 + $0x890] sm:$0xff] %v2171_v50  ;;  %1760 = vmatpush.bf16.msrb.mxu0 %v3318_v27  ;;  %1773 = vmatpush.bf16.msrb.mxu1 %v3322_v28  ;;  %v2186_v50 = vperm.slane %v5117_v3, 5  ;;  %v3055_v11 = vld [vmem:[%s5327_s3 + $0x70] sm:$0xf0]  ;;  %v3061_v15 = vld [vmem:[%s5327_s3 + $0x38] sm:$0xf] }
 0x117   : > { %2716 = vst [vmem:[%s3817_s19 + $0x898] sm:$0xff] %v2172_v53  ;;  %v2187_v53 = vperm.slane %v5117_v3, 6  ;;  %1735 = vmatpush.bf16.msra.mxu2 %v3246_v41  ;;  %v2191_v3 = vperm.slane %v5186_v39, 2  ;;  %v3580_v16 = vld [vmem:[%s5327_s3 + $0x74] sm:$0xf0]  ;;  %v3058_v24 = vor.u32 %v3571_v10, %v3055_v11  ;;  %v2198_v28 = vperm.slane %v1898_v6, 1 }
 0x118   : > { %2717 = vst [vmem:[%s3817_s19 + $0x8a0] sm:$0xff] %v2173_v57  ;;  %v3186_v57 = vor.u32 %v3603_v43, %v3183_v44  ;;  %v3572_v18 = vld [vmem:[%s5327_s3 + $0x3c] sm:$0xf]  ;;  %v2200_v31 = vperm.slane %v1898_v6, 3  ;;  %v2202_v34 = vperm.slane %v1898_v6, 5  ;;  %v2203_v35 = vperm.slane %v1898_v6, 6 }
 0x119   : > { %2718 = vst [vmem:[%s3817_s19 + $0x8a8] sm:$0xff] %v2174_v62  ;;  %1748 = vmatpush.bf16.msra.mxu3 %v3250_v42  ;;  %v3194_v62 = vor.u32 %v3604_v51, %v3191_v52  ;;  %v3063_v19 = vld [vmem:[%s5327_s3 + $0x78] sm:$0xf0]  ;;  %v899_v37 = vld [vmem:[%s5328_s4] sm:$0xff] }
 0x11a   : > { %2719 = vst [vmem:[%s3817_s19 + $0x8b0] sm:$0xff] %v2175_v1  ;;  %1761 = vmatpush.bf16.msrb.mxu0 %v3254_v46  ;;  %1774 = vmatpush.bf16.msrb.mxu1 %v3258_v47  ;;  %v2190_v1 = vperm.slane %v5186_v39, 1  ;;  %v3066_v27 = vor.u32 %v3572_v18, %v3063_v19  ;;  %v905_v38 = vperm.slane %v899_v37, 2  ;;  %v903_v44 = vperm.slane %v899_v37, 0 }
 0x11b   : > { %2720 = vst [vmem:[%s3817_s19 + $0x8b8] sm:$0xff] %v2176_v4  ;;  %v3053_v4 = vld [vmem:[%s5327_s3 + $0x30] sm:$0xf]  ;;  %1736 = vmatpush.bf16.msra.mxu2 %v3182_v56  ;;  %v910_v54 = vperm.slane %v899_v37, 7 }
 0x11c   : > { %2721 = vst [vmem:[%s3817_s19 + $0x8c0] sm:$0xff] %v2177_v9  ;;  %v3122_v9 = vor.u32 %v3587_v58, %v3119_v59  ;;  %v3054_v23 = vor.u32 %v3579_v5, %v3053_v4  ;;  %v907_v58 = vperm.slane %v899_v37, 4  ;;  %v908_v59 = vperm.slane %v899_v37, 5 }
 0x11d   : > { %2722 = vst [vmem:[%s3817_s19 + $0x8c8] sm:$0xff] %v2178_v14  ;;  %1749 = vmatpush.bf16.msra.mxu3 %v3186_v57  ;;  %v3130_v14 = vor.u32 %v3588_v2, %v3127_v29  ;;  %v900_v2 = vld [vmem:[%s5328_s4 + $0x8] sm:$0xff] }
 0x11e   : > { %2723 = vst [vmem:[%s3817_s19 + $0x8d0] sm:$0xff] %v2179_v17  ;;  %1762 = vmatpush.bf16.msrb.mxu0 %v3190_v61  ;;  %1775 = vmatpush.bf16.msrb.mxu1 %v3194_v62  ;;  %v2194_v17 = vperm.slane %v5186_v39, 5  ;;  %v913_v4 = vperm.slane %v900_v2, 2  ;;  %v914_v5 = vperm.slane %v900_v2, 3  ;;  %v911_v10 = vperm.slane %v900_v2, 0 }
 0x11f   : > { %2724 = vst [vmem:[%s3817_s19 + $0x8d8] sm:$0xff] %v2180_v20  ;;  %v2195_v20 = vperm.slane %v5186_v39, 6  ;;  %1737 = vmatpush.bf16.msra.mxu2 %v3118_v8  ;;  %v906_v39 = vperm.slane %v899_v37, 3  ;;  %v912_v11 = vperm.slane %v900_v2, 1 }
 0x120   : > { %2725 = vst [vmem:[%s3817_s19 + $0x8e0] sm:$0xff] %v2181_v26  ;;  %v3062_v26 = vor.u32 %v3580_v16, %v3061_v15 }
 0x121   : > { %2726 = vst [vmem:[%s3817_s19 + $0x8e8] sm:$0xff] %v2182_v32  ;;  %1750 = vmatpush.bf16.msra.mxu3 %v3122_v9  ;;  %v2201_v32 = vperm.slane %v1898_v6, 4 }
 0x122   : > { %2727 = vst [vmem:[%s3817_s19 + $0x8f0] sm:$0xff] %v2183_v36  ;;  %1763 = vmatpush.bf16.msrb.mxu0 %v3126_v13  ;;  %1776 = vmatpush.bf16.msrb.mxu1 %v3130_v14  ;;  %v2204_v36 = vperm.slane %v1898_v6, 7 }
 0x123   : > { %2728 = vst [vmem:[%s3817_s19 + $0x8f8] sm:$0xff] %v2184_v40  ;;  %1738 = vmatpush.bf16.msra.mxu2 %v3054_v23 }
 0x124   : > { %2729 = vst [vmem:[%s3817_s19 + $0x900] sm:$0xff] %v2185_v45  ;;  %v904_v45 = vperm.slane %v899_v37, 1 }
 0x125   : > { %2730 = vst [vmem:[%s3817_s19 + $0x908] sm:$0xff] %v2186_v50  ;;  %1751 = vmatpush.bf16.msra.mxu3 %v3058_v24 }
 0x126   : > { %2731 = vst [vmem:[%s3817_s19 + $0x910] sm:$0xff] %v2187_v53  ;;  %1764 = vmatpush.bf16.msrb.mxu0 %v3062_v26  ;;  %1777 = vmatpush.bf16.msrb.mxu1 %v3066_v27  ;;  %v909_v53 = vperm.slane %v899_v37, 6  ;;  %v915_v27 = vperm.slane %v900_v2, 4 }
 0x127   : > { %2732 = vst [vmem:[%s3817_s19 + $0x918] sm:$0xff] %v2188_v21  ;;  %1739 = vmatmul.bf16.vlgmr.msra.gmra.mxu2 %v4766_v33 }
 0x128   : > { %2733 = vst [vmem:[%s3817_s19 + $0x920] sm:$0xff] %v2189_v60  ;;  %1752 = vmatmul.bf16.vlgmr.msra.gmra.mxu3 %v4766_v33 }
 0x129   : > { %2734 = vst [vmem:[%s3817_s19 + $0x928] sm:$0xff] %v2190_v1  ;;  %1765 = vmatmul.bf16.vlgmr.msrb.gmra.mxu0 %v4766_v33  ;;  %1778 = vmatmul.bf16.vlgmr.msrb.gmra.mxu1 %v4766_v33 }
 0x12a   : > { %2735 = vst [vmem:[%s3817_s19 + $0x930] sm:$0xff] %v2191_v3 }
 0x12b   : > { %2736 = vst [vmem:[%s3817_s19 + $0x938] sm:$0xff] %v2192_v7 }
 0x12c   : > { %2737 = vst [vmem:[%s3817_s19 + $0x940] sm:$0xff] %v2193_v12 }
 0x12d   : > { %2738 = vst [vmem:[%s3817_s19 + $0x948] sm:$0xff] %v2194_v17 }
 0x12e   : > { %2739 = vst [vmem:[%s3817_s19 + $0x950] sm:$0xff] %v2195_v20  ;;  %v917_v20 = vperm.slane %v900_v2, 6 }
 0x12f   : > { %2740 = vst [vmem:[%s3817_s19 + $0x958] sm:$0xff] %v2196_v22  ;;  %v918_v22 = vperm.slane %v900_v2, 7 }
 0x130   : > { %2741 = vst [vmem:[%s3817_s19 + $0x960] sm:$0xff] %v2197_v25 }
 0x131   : > { %2742 = vst [vmem:[%s3817_s19 + $0x968] sm:$0xff] %v2198_v28  ;;  %v916_v28 = vperm.slane %v900_v2, 5 }
 0x132   : > { %2743 = vst [vmem:[%s3817_s19 + $0x970] sm:$0xff] %v2199_v30 }
 0x133   : > { %2744 = vst [vmem:[%s3817_s19 + $0x978] sm:$0xff] %v2200_v31 }
 0x134   : > { %2745 = vst [vmem:[%s3817_s19 + $0x980] sm:$0xff] %v2201_v32 }
 0x135   : > { %2746 = vst [vmem:[%s3817_s19 + $0x988] sm:$0xff] %v2202_v34 }
 0x136   : > { %2747 = vst [vmem:[%s3817_s19 + $0x990] sm:$0xff] %v2203_v35 }
 0x137   : > { %2748 = vst [vmem:[%s3817_s19 + $0x998] sm:$0xff] %v2204_v36 }
 0x162   : > { %v1610_v40 = vpop.f32.mrf.mxu0  ;;  %v1623_v41 = vpop.f32.mrf.mxu1 }
 0x163   : > { %v1611_v42 = vadd.f32 %v1610_v40, %v905_v38  ;;  %v1624_v43 = vadd.f32 %v1623_v41, %v906_v39 }
 0x165   : > { %1851 = vst [vmem:[%s3817_s19 + $0xb0] sm:$0xff] %v1611_v42 }
 0x166   : > { %1852 = vst [vmem:[%s3817_s19 + $0xb8] sm:$0xff] %v1624_v43 }
 0x167   : > { %v1584_v33 = vpop.f32.mrf.mxu2  ;;  %v1597_v46 = vpop.f32.mrf.mxu3 }
 0x168   : > { %v1585_v47 = vadd.f32 %v1584_v33, %v903_v44  ;;  %v1598_v48 = vadd.f32 %v1597_v46, %v904_v45 }
 0x16a   : > { %1849 = vst [vmem:[%s3817_s19 + $0xa0] sm:$0xff] %v1585_v47  ;;  %v1612_v49 = vpop.f32.mrf.mxu0  ;;  %v1625_v50 = vpop.f32.mrf.mxu1 }
 0x16b   : > { %1850 = vst [vmem:[%s3817_s19 + $0xa8] sm:$0xff] %v1598_v48 }
 0x16f   : > { %v1586_v51 = vpop.f32.mrf.mxu2  ;;  %v1599_v52 = vpop.f32.mrf.mxu3 }
 0x173   : > { %v1662_v55 = vpop.f32.mrf.mxu0 }
 0x174   : > { %v1675_v21 = vpop.f32.mrf.mxu1  ;;  %v1663_v56 = vadd.f32 %v1662_v55, %v909_v53 }
 0x175   : > { %v1676_v57 = vadd.f32 %v1675_v21, %v910_v54 }
 0x176   : > { %1855 = vst [vmem:[%s3817_s19 + $0xd0] sm:$0xff] %v1663_v56 }
 0x177   : > { %1856 = vst [vmem:[%s3817_s19 + $0xd8] sm:$0xff] %v1676_v57 }
 0x178   : > { %v1636_v60 = vpop.f32.mrf.mxu2 }
 0x179   : > { %v1649_v61 = vpop.f32.mrf.mxu3  ;;  %v1637_v62 = vadd.f32 %v1636_v60, %v907_v58 }
 0x17a   : > { %v1650_v63 = vadd.f32 %v1649_v61, %v908_v59 }
 0x17b   : > { %1853 = vst [vmem:[%s3817_s19 + $0xc0] sm:$0xff] %v1637_v62  ;;  %v1664_v0 = vpop.f32.mrf.mxu0 }
 0x17c   : > { %v1677_v1 = vpop.f32.mrf.mxu1  ;;  %1854 = vst [vmem:[%s3817_s19 + $0xc8] sm:$0xff] %v1650_v63 }
 0x180   : > { %v1638_v29 = vpop.f32.mrf.mxu2 }
 0x181   : > { %v1651_v3 = vpop.f32.mrf.mxu3 }
 0x186   : > { %v1714_v6 = vpop.f32.mrf.mxu0 }
 0x187   : > { %v1715_v8 = vadd.f32 %v1714_v6, %v913_v4 }
 0x188   : > { %v1727_v7 = vpop.f32.mrf.mxu1 }
 0x189   : > { %v1728_v9 = vadd.f32 %v1727_v7, %v914_v5  ;;  %1859 = vst [vmem:[%s3817_s19 + $0xf0] sm:$0xff] %v1715_v8 }
 0x18b   : > { %1860 = vst [vmem:[%s3817_s19 + $0xf8] sm:$0xff] %v1728_v9  ;;  %v1688_v12 = vpop.f32.mrf.mxu2  ;;  %v1701_v13 = vpop.f32.mrf.mxu3 }
 0x18c   : > { %v1689_v14 = vadd.f32 %v1688_v12, %v911_v10  ;;  %v1702_v15 = vadd.f32 %v1701_v13, %v912_v11 }
 0x18e   : > { %1857 = vst [vmem:[%s3817_s19 + $0xe0] sm:$0xff] %v1689_v14  ;;  %v1716_v16 = vpop.f32.mrf.mxu0 }
 0x18f   : > { %1858 = vst [vmem:[%s3817_s19 + $0xe8] sm:$0xff] %v1702_v15 }
 0x190   : > { %v1729_v17 = vpop.f32.mrf.mxu1 }
 0x193   : > { %v1690_v18 = vpop.f32.mrf.mxu2  ;;  %v1703_v19 = vpop.f32.mrf.mxu3 }
 0x1a6   : > { %v1766_v23 = vpop.f32.mrf.mxu0  ;;  %v1779_v24 = vpop.f32.mrf.mxu1 }
 0x1a7   : > { %v1767_v25 = vadd.f32 %v1766_v23, %v917_v20  ;;  %v1780_v26 = vadd.f32 %v1779_v24, %v918_v22 }
 0x1a9   : > { %1863 = vst [vmem:[%s3817_s19 + $0x110] sm:$0xff] %v1767_v25 }
 0x1aa   : > { %1864 = vst [vmem:[%s3817_s19 + $0x118] sm:$0xff] %v1780_v26  ;;  %v1740_v30 = vpop.f32.mrf.mxu2 }
 0x1ab   : > { %v1753_v31 = vpop.f32.mrf.mxu3  ;;  %v1741_v32 = vadd.f32 %v1740_v30, %v915_v27 }
 0x1ac   : > { %v1754_v34 = vadd.f32 %v1753_v31, %v916_v28 }
 0x1ad   : > { %1861 = vst [vmem:[%s3817_s19 + $0x100] sm:$0xff] %v1741_v32 }
 0x1ae   : > { %v1768_v35 = vpop.f32.mrf.mxu0  ;;  %v1781_v36 = vpop.f32.mrf.mxu1  ;;  %1862 = vst [vmem:[%s3817_s19 + $0x108] sm:$0xff] %v1754_v34 }
 0x1b2   : > { %v1742_v37 = vpop.f32.mrf.mxu2 }
 0x1b3   : > { %v1755_v38 = vpop.f32.mrf.mxu3 }
 0x1b4 PF: > { %s17_s24 = sadd.s32 1, %s3710_s24  }
 0x1b5   : > { %p14_p4 = scmp.ge.s32.totalorder %s17_s24, 4  }
 0x1b7   :  { %16 = sbr.rel (!%p14_p4) target bundleno = 1 (0x1), region = 78 }

</bundles_post_ra>
